<compile_context>
chip_gen: v5e
topology: v5e:2x2
jax: 0.10.0
libtpu: 0.0.40
codegen_flags: <defaults>
</compile_context>

<pallas_src>
import jax
import jax.numpy as jnp
from jax import lax
from jax.experimental import pallas as pl
from jax.experimental.pallas import tpu as pltpu

CPAD = 128  # all channel dims padded to one lane/MXU tile width


def _round_up(x, m):
    return (x + m - 1) // m * m


# --------------------------------------------------------------------------
# Kernels
# --------------------------------------------------------------------------
def _gcn_layer0_kernel(adj_ref, y_ref, d_ref, b_ref, wn_ref, out_ref, acc_ref):
    # acc   = A_hat @ Y0                        (K-tiled, f32 accumulation)
    # h     = relu(D^{-1/2} acc + b0)           (layer-0 output + act)
    # out   = D^{-1/2} (h W1), stored bf16      (fused layer-1 transform)
    k = pl.program_id(1)

    @pl.when(k == 0)
    def _():
        acc_ref[...] = jnp.zeros_like(acc_ref)

    acc_ref[...] += jnp.dot(adj_ref[...], y_ref[...],
                            preferred_element_type=jnp.float32)

    @pl.when(k == pl.num_programs(1) - 1)
    def _():
        d = d_ref[...]
        h = jnp.maximum(d * acc_ref[...] + b_ref[...], 0.0)
        # TODO(synk): F.dropout(p=0.5) is training-only; eval mode == identity.
        y_next = d * jnp.dot(h.astype(jnp.bfloat16), wn_ref[...],
                             preferred_element_type=jnp.float32)
        out_ref[...] = y_next.astype(out_ref.dtype)


def _gcn_layer_final_kernel(adj_ref, y_ref, d_ref, b_ref, out_ref, acc_ref):
    # out = D^{-1/2} (A_hat @ Y1) + b1          (last layer: no norm/act/dropout)
    k = pl.program_id(1)

    @pl.when(k == 0)
    def _():
        acc_ref[...] = jnp.zeros_like(acc_ref)

    acc_ref[...] += jnp.dot(adj_ref[...], y_ref[...],
                            preferred_element_type=jnp.float32)

    @pl.when(k == pl.num_programs(1) - 1)
    def _():
        out_ref[...] = d_ref[...] * acc_ref[...] + b_ref[...]


# --------------------------------------------------------------------------
# Wrapper
# --------------------------------------------------------------------------
def gnn_forward(x, adj, params):
    """x: [N, Cin] f32, adj: [N, N] dense symmetric 0/1 adjacency (no self loops)."""
    w0, b0, w1, b1 = params
    N, cin = x.shape
    hid = w0.shape[1]
    cout = w1.shape[1]
    f32 = jnp.float32
    bf16 = jnp.bfloat16

    # ---- generation-aware tiling / VMEM budget ----
    vmem_cap = 64 * 1024 * 1024
    try:
        info = pltpu.get_tpu_info()
        vmem_cap = getattr(info, "vmem_capacity_bytes", vmem_cap)
    except Exception:
        pass
    if vmem_cap >= 128 * 1024 * 1024:        # v5e / v6e: 128 MiB VMEM
        t_max, vmem_limit = 512, 100 * 1024 * 1024
    else:                                    # v7x: 64 MiB / TensorCore
        t_max, vmem_limit = 256, 40 * 1024 * 1024

    T = min(t_max, _round_up(N, 128))        # square adjacency tile (rows, K)
    np_ = _round_up(N, T)
    nr = np_ // T                            # row tiles  ("parallel")
    nk = np_ // T                            # K tiles    ("arbitrary", accum)

    # ---- adjacency: cast to bf16 first, pad, fold self-loops into diag ----
    adj_bf = adj.astype(bf16)                # 0/1 entries -> exact in bf16
    if np_ > N:
        adj_bf = jnp.pad(adj_bf, ((0, np_ - N), (0, np_ - N)))
    diag = jnp.arange(np_)
    adj_bf = adj_bf.at[diag, diag].set(jnp.asarray(1.0, bf16))   # A + I

    # ---- degrees: one wrapper reduction (adjacency is symmetric) ----
    deg = jnp.sum(adj.astype(f32), axis=1) + 1.0                 # + self loop
    d = lax.rsqrt(deg).reshape(N, 1)
    if np_ > N:
        d = jnp.pad(d, ((0, np_ - N), (0, 0)), constant_values=1.0)

    # ---- channel-padded weights (lane-dense, full MXU width) ----
    w0_p = jnp.zeros((cin, CPAD), f32).at[:, :hid].set(w0)
    b0_p = jnp.zeros((1, CPAD), f32).at[:, :hid].set(b0.reshape(1, hid))
    w1_bf = jnp.zeros((CPAD, CPAD), f32).at[:hid, :cout].set(w1).astype(bf16)
    b1_p = jnp.zeros((1, CPAD), f32).at[:, :cout].set(b1.reshape(1, cout))

    # ---- layer-0 feature transform in the wrapper (tiny matmul; XLA fuses
    #      the pad, the d-scale and the bf16 cast) -> bf16 resident Y0 ----
    x_p = x.astype(f32)
    if np_ > N:
        x_p = jnp.pad(x_p, ((0, np_ - N), (0, 0)))
    y0 = (d * jnp.dot(x_p, w0_p)).astype(bf16)      # D^{-1/2} X W0   [np_, 128]

    cparams = pltpu.CompilerParams(
        dimension_semantics=("parallel", "arbitrary"),
        vmem_limit_bytes=vmem_limit,
    )
    adj_spec = pl.BlockSpec((T, T), lambda i, k: (i, k))       # streamed rows/K
    y_spec = pl.BlockSpec((T, CPAD), lambda i, k: (k, 0))      # bf16 features
    d_spec = pl.BlockSpec((T, 1), lambda i, k: (i, 0))
    vec_spec = pl.BlockSpec((1, CPAD), lambda i, k: (0, 0))    # bias
    w_spec = pl.BlockSpec((CPAD, CPAD), lambda i, k: (0, 0))   # W1 (bf16)
    out_spec = pl.BlockSpec((T, CPAD), lambda i, k: (i, 0))
    acc_scratch = pltpu.VMEM((T, CPAD), f32)

    # ---- layer 0 aggregation + ReLU, fused with layer-1 transform -> Y1 (bf16) ----
    y1 = pl.pallas_call(
        _gcn_layer0_kernel,
        out_shape=jax.ShapeDtypeStruct((np_, CPAD), bf16),
        grid=(nr, nk),
        in_specs=[adj_spec, y_spec, d_spec, vec_spec, w_spec],
        out_specs=out_spec,
        scratch_shapes=[acc_scratch],
        compiler_params=cparams,
    )(adj_bf, y0, d, b0_p, w1_bf)

    # ---- layer 1 aggregation (final output, f32) ----
    out = pl.pallas_call(
        _gcn_layer_final_kernel,
        out_shape=jax.ShapeDtypeStruct((np_, CPAD), f32),
        grid=(nr, nk),
        in_specs=[adj_spec, y_spec, d_spec, vec_spec],
        out_specs=out_spec,
        scratch_shapes=[acc_scratch],
        compiler_params=cparams,
    )(adj_bf, y1, d, b1_p)

    return out[:N, :cout]


def init_params(key, in_channels, hidden_channels, out_channels):
    """Deterministic Glorot-uniform weights, zero biases (GCNConv defaults)."""
    k0, k1 = jax.random.split(key)

    def glorot(k, fan_in, fan_out):
        lim = jnp.sqrt(6.0 / (fan_in + fan_out))
        return jax.random.uniform(
            k, (fan_in, fan_out), jnp.float32, minval=-lim, maxval=lim
        )

    w0 = glorot(k0, in_channels, hidden_channels)
    b0 = jnp.zeros((1, hidden_channels), jnp.float32)
    w1 = glorot(k1, hidden_channels, out_channels)
    b1 = jnp.zeros((1, out_channels), jnp.float32)
    return (w0, b0, w1, b1)


if __name__ == "__main__":
    # Small shapes consistent with the module: N nodes, in=16, hidden=32, out=8
    N, IN_C, HID_C, OUT_C = 256, 16, 32, 8

    key = jax.random.PRNGKey(0)
    kx, ka, kp = jax.random.split(key, 3)

    x = jax.random.normal(kx, (N, IN_C), jnp.float32)

    # Random symmetric adjacency (no self loops; wrapper adds them).
    upper = (jax.random.uniform(ka, (N, N)) < 0.1).astype(jnp.float32)
    upper = jnp.triu(upper, k=1)
    adj = upper + upper.T

    params = init_params(kp, IN_C, HID_C, OUT_C)

    out = jax.jit(gnn_forward)(x, adj, params)
    jax.block_until_ready(out)
    assert out.shape == (N, OUT_C)
    print("KERNEL_OK")
</pallas_src>

<mosaic_0001>
module attributes {stable_mosaic.version = 11 : i64} {
  func.func @_gcn_layer0_kernel(%arg0: i32, %arg1: i32, %arg2: memref<256x256xbf16, #tpu.memory_space<vmem>>, %arg3: memref<256x128xbf16, #tpu.memory_space<vmem>>, %arg4: memref<256x1xf32, #tpu.memory_space<vmem>>, %arg5: memref<1x128xf32, #tpu.memory_space<vmem>>, %arg6: memref<128x128xbf16, #tpu.memory_space<vmem>>, %arg7: memref<256x128xbf16, #tpu.memory_space<vmem>>, %arg8: memref<256x128xf32, #tpu.memory_space<vmem>>) attributes {dimension_semantics = [#tpu.dimension_semantics<parallel>, #tpu.dimension_semantics<arbitrary>], iteration_bounds = array<i64: 1, 1>, scalar_prefetch = 0 : i64, scratch_operands = 1 : i64, tpu.core_type = #tpu.core_type<tc>, window_params = [{transform_indices = @transform_0, window_bounds = array<i64: 256, 256>}, {transform_indices = @transform_1, window_bounds = array<i64: 256, 128>}, {transform_indices = @transform_2, window_bounds = array<i64: 256, 1>}, {pipeline_mode = #tpu.pipeline_mode<synchronous>, transform_indices = @transform_3, window_bounds = array<i64: 1, 128>}, {pipeline_mode = #tpu.pipeline_mode<synchronous>, transform_indices = @transform_4, window_bounds = array<i64: 128, 128>}, {transform_indices = @transform_5, window_bounds = array<i64: 256, 128>}]} {
    %c0_i32 = arith.constant 0 : i32
    %0 = arith.cmpi eq, %arg1, %c0_i32 : i32
    %1 = arith.extui %0 : i1 to i32
    %c0_i32_0 = arith.constant 0 : i32
    %2 = arith.cmpi ne, %1, %c0_i32_0 : i32
    scf.if %2 {
      %cst_10 = arith.constant 0.000000e+00 : f32
      %12 = vector.broadcast %cst_10 : f32 to vector<256x128xf32>
      %c0_11 = arith.constant 0 : index
      %c0_12 = arith.constant 0 : index
      %13 = vector.load %arg8[%c0_11, %c0_12] : memref<256x128xf32, #tpu.memory_space<vmem>>, vector<256x128xf32>
      tpu.vector_store %arg8[%c0_11, %c0_12], %12 {strides = array<i32>} : memref<256x128xf32, #tpu.memory_space<vmem>>, vector<256x128xf32>,
    } else {
    }
    %c0 = arith.constant 0 : index
    %c0_1 = arith.constant 0 : index
    %3 = vector.load %arg8[%c0, %c0_1] : memref<256x128xf32, #tpu.memory_space<vmem>>, vector<256x128xf32>
    %c0_2 = arith.constant 0 : index
    %c0_3 = arith.constant 0 : index
    %4 = vector.load %arg2[%c0_2, %c0_3] : memref<256x256xbf16, #tpu.memory_space<vmem>>, vector<256x256xbf16>
    %c0_4 = arith.constant 0 : index
    %c0_5 = arith.constant 0 : index
    %5 = vector.load %arg3[%c0_4, %c0_5] : memref<256x128xbf16, #tpu.memory_space<vmem>>, vector<256x128xbf16>
    %cst = arith.constant dense<0.000000e+00> : vector<256x128xf32>
    %6 = tpu.matmul %4, %5, %cst {dimension_numbers = #tpu.dot_dimension_numbers<[1], [0], [0], [1], [0, 0, 1, 1], [], []>} : vector<256x256xbf16>, vector<256x128xbf16>, vector<256x128xf32> -> vector<256x128xf32>
    %7 = arith.addf %3, %6 : vector<256x128xf32>
    %c0_6 = arith.constant 0 : index
    %c0_7 = arith.constant 0 : index
    %8 = vector.load %arg8[%c0_6, %c0_7] : memref<256x128xf32, #tpu.memory_space<vmem>>, vector<256x128xf32>
    tpu.vector_store %arg8[%c0_6, %c0_7], %7 {strides = array<i32>} : memref<256x128xf32, #tpu.memory_space<vmem>>, vector<256x128xf32>,
    %c0_i32_8 = arith.constant 0 : i32
    %9 = arith.cmpi eq, %arg1, %c0_i32_8 : i32
    %10 = arith.extui %9 : i1 to i32
    %c0_i32_9 = arith.constant 0 : i32
    %11 = arith.cmpi ne, %10, %c0_i32_9 : i32
    scf.if %11 {
      %c0_10 = arith.constant 0 : index
      %c0_11 = arith.constant 0 : index
      %12 = vector.load %arg4[%c0_10, %c0_11] : memref<256x1xf32, #tpu.memory_space<vmem>>, vector<256x1xf32>
      %c0_12 = arith.constant 0 : index
      %c0_13 = arith.constant 0 : index
      %13 = vector.load %arg8[%c0_12, %c0_13] : memref<256x128xf32, #tpu.memory_space<vmem>>, vector<256x128xf32>
      %14 = vector.broadcast %12 : vector<256x1xf32> to vector<256x128xf32>
      %15 = arith.mulf %14, %13 : vector<256x128xf32>
      %c0_14 = arith.constant 0 : index
      %c0_15 = arith.constant 0 : index
      %16 = vector.load %arg5[%c0_14, %c0_15] : memref<1x128xf32, #tpu.memory_space<vmem>>, vector<1x128xf32>
      %17 = vector.broadcast %16 : vector<1x128xf32> to vector<256x128xf32>
      %18 = arith.addf %15, %17 : vector<256x128xf32>
      %cst_16 = arith.constant 0.000000e+00 : f32
      %19 = vector.broadcast %cst_16 : f32 to vector<256x128xf32>
      %20 = arith.maximumf %18, %19 : vector<256x128xf32>
      %21 = arith.truncf %20 : vector<256x128xf32> to vector<256x128xbf16>
      %c0_17 = arith.constant 0 : index
      %c0_18 = arith.constant 0 : index
      %22 = vector.load %arg6[%c0_17, %c0_18] : memref<128x128xbf16, #tpu.memory_space<vmem>>, vector<128x128xbf16>
      %cst_19 = arith.constant dense<0.000000e+00> : vector<256x128xf32>
      %23 = tpu.matmul %21, %22, %cst_19 {dimension_numbers = #tpu.dot_dimension_numbers<[1], [0], [0], [1], [0, 0, 1, 1], [], []>} : vector<256x128xbf16>, vector<128x128xbf16>, vector<256x128xf32> -> vector<256x128xf32>
      %24 = vector.broadcast %12 : vector<256x1xf32> to vector<256x128xf32>
      %25 = arith.mulf %24, %23 : vector<256x128xf32>
      %26 = arith.truncf %25 : vector<256x128xf32> to vector<256x128xbf16>
      %c0_20 = arith.constant 0 : index
      %c0_21 = arith.constant 0 : index
      %27 = vector.load %arg7[%c0_20, %c0_21] : memref<256x128xbf16, #tpu.memory_space<vmem>>, vector<256x128xbf16>
      tpu.vector_store %arg7[%c0_20, %c0_21], %26 {strides = array<i32>} : memref<256x128xbf16, #tpu.memory_space<vmem>>, vector<256x128xbf16>,
    } else {
    }
    return
  }
  func.func @transform_0(%arg0: i32, %arg1: i32) -> (i32, i32) {
    %c0_i32 = arith.constant 0 : i32
    return %arg0, %arg1 : i32, i32
  }
  func.func @transform_1(%arg0: i32, %arg1: i32) -> (i32, i32) {
    %c0_i32 = arith.constant 0 : i32
    %c0_i32_0 = arith.constant 0 : i32
    return %arg1, %c0_i32 : i32, i32
  }
  func.func @transform_2(%arg0: i32, %arg1: i32) -> (i32, i32) {
    %c0_i32 = arith.constant 0 : i32
    %c0_i32_0 = arith.constant 0 : i32
    return %arg0, %c0_i32 : i32, i32
  }
  func.func @transform_3(%arg0: i32, %arg1: i32) -> (i32, i32) {
    %c0_i32 = arith.constant 0 : i32
    %c0_i32_0 = arith.constant 0 : i32
    %c0_i32_1 = arith.constant 0 : i32
    return %c0_i32, %c0_i32_0 : i32, i32
  }
  func.func @transform_4(%arg0: i32, %arg1: i32) -> (i32, i32) {
    %c0_i32 = arith.constant 0 : i32
    %c0_i32_0 = arith.constant 0 : i32
    %c0_i32_1 = arith.constant 0 : i32
    return %c0_i32, %c0_i32_0 : i32, i32
  }
  func.func @transform_5(%arg0: i32, %arg1: i32) -> (i32, i32) {
    %c0_i32 = arith.constant 0 : i32
    %c0_i32_0 = arith.constant 0 : i32
    return %arg0, %c0_i32 : i32, i32
  }
}

module attributes {stable_mosaic.version = 11 : i64} {
  func.func @_gcn_layer_final_kernel(%arg0: i32, %arg1: i32, %arg2: memref<256x256xbf16, #tpu.memory_space<vmem>>, %arg3: memref<256x128xbf16, #tpu.memory_space<vmem>>, %arg4: memref<256x1xf32, #tpu.memory_space<vmem>>, %arg5: memref<1x128xf32, #tpu.memory_space<vmem>>, %arg6: memref<256x128xf32, #tpu.memory_space<vmem>>, %arg7: memref<256x128xf32, #tpu.memory_space<vmem>>) attributes {dimension_semantics = [#tpu.dimension_semantics<parallel>, #tpu.dimension_semantics<arbitrary>], iteration_bounds = array<i64: 1, 1>, scalar_prefetch = 0 : i64, scratch_operands = 1 : i64, tpu.core_type = #tpu.core_type<tc>, window_params = [{transform_indices = @transform_0, window_bounds = array<i64: 256, 256>}, {transform_indices = @transform_1, window_bounds = array<i64: 256, 128>}, {transform_indices = @transform_2, window_bounds = array<i64: 256, 1>}, {pipeline_mode = #tpu.pipeline_mode<synchronous>, transform_indices = @transform_3, window_bounds = array<i64: 1, 128>}, {transform_indices = @transform_4, window_bounds = array<i64: 256, 128>}]} {
    %c0_i32 = arith.constant 0 : i32
    %0 = arith.cmpi eq, %arg1, %c0_i32 : i32
    %1 = arith.extui %0 : i1 to i32
    %c0_i32_0 = arith.constant 0 : i32
    %2 = arith.cmpi ne, %1, %c0_i32_0 : i32
    scf.if %2 {
      %cst_10 = arith.constant 0.000000e+00 : f32
      %12 = vector.broadcast %cst_10 : f32 to vector<256x128xf32>
      %c0_11 = arith.constant 0 : index
      %c0_12 = arith.constant 0 : index
      %13 = vector.load %arg7[%c0_11, %c0_12] : memref<256x128xf32, #tpu.memory_space<vmem>>, vector<256x128xf32>
      tpu.vector_store %arg7[%c0_11, %c0_12], %12 {strides = array<i32>} : memref<256x128xf32, #tpu.memory_space<vmem>>, vector<256x128xf32>,
    } else {
    }
    %c0 = arith.constant 0 : index
    %c0_1 = arith.constant 0 : index
    %3 = vector.load %arg7[%c0, %c0_1] : memref<256x128xf32, #tpu.memory_space<vmem>>, vector<256x128xf32>
    %c0_2 = arith.constant 0 : index
    %c0_3 = arith.constant 0 : index
    %4 = vector.load %arg2[%c0_2, %c0_3] : memref<256x256xbf16, #tpu.memory_space<vmem>>, vector<256x256xbf16>
    %c0_4 = arith.constant 0 : index
    %c0_5 = arith.constant 0 : index
    %5 = vector.load %arg3[%c0_4, %c0_5] : memref<256x128xbf16, #tpu.memory_space<vmem>>, vector<256x128xbf16>
    %cst = arith.constant dense<0.000000e+00> : vector<256x128xf32>
    %6 = tpu.matmul %4, %5, %cst {dimension_numbers = #tpu.dot_dimension_numbers<[1], [0], [0], [1], [0, 0, 1, 1], [], []>} : vector<256x256xbf16>, vector<256x128xbf16>, vector<256x128xf32> -> vector<256x128xf32>
    %7 = arith.addf %3, %6 : vector<256x128xf32>
    %c0_6 = arith.constant 0 : index
    %c0_7 = arith.constant 0 : index
    %8 = vector.load %arg7[%c0_6, %c0_7] : memref<256x128xf32, #tpu.memory_space<vmem>>, vector<256x128xf32>
    tpu.vector_store %arg7[%c0_6, %c0_7], %7 {strides = array<i32>} : memref<256x128xf32, #tpu.memory_space<vmem>>, vector<256x128xf32>,
    %c0_i32_8 = arith.constant 0 : i32
    %9 = arith.cmpi eq, %arg1, %c0_i32_8 : i32
    %10 = arith.extui %9 : i1 to i32
    %c0_i32_9 = arith.constant 0 : i32
    %11 = arith.cmpi ne, %10, %c0_i32_9 : i32
    scf.if %11 {
      %c0_10 = arith.constant 0 : index
      %c0_11 = arith.constant 0 : index
      %12 = vector.load %arg4[%c0_10, %c0_11] : memref<256x1xf32, #tpu.memory_space<vmem>>, vector<256x1xf32>
      %c0_12 = arith.constant 0 : index
      %c0_13 = arith.constant 0 : index
      %13 = vector.load %arg7[%c0_12, %c0_13] : memref<256x128xf32, #tpu.memory_space<vmem>>, vector<256x128xf32>
      %14 = vector.broadcast %12 : vector<256x1xf32> to vector<256x128xf32>
      %15 = arith.mulf %14, %13 : vector<256x128xf32>
      %c0_14 = arith.constant 0 : index
      %c0_15 = arith.constant 0 : index
      %16 = vector.load %arg5[%c0_14, %c0_15] : memref<1x128xf32, #tpu.memory_space<vmem>>, vector<1x128xf32>
      %17 = vector.broadcast %16 : vector<1x128xf32> to vector<256x128xf32>
      %18 = arith.addf %15, %17 : vector<256x128xf32>
      %c0_16 = arith.constant 0 : index
      %c0_17 = arith.constant 0 : index
      %19 = vector.load %arg6[%c0_16, %c0_17] : memref<256x128xf32, #tpu.memory_space<vmem>>, vector<256x128xf32>
      tpu.vector_store %arg6[%c0_16, %c0_17], %18 {strides = array<i32>} : memref<256x128xf32, #tpu.memory_space<vmem>>, vector<256x128xf32>,
    } else {
    }
    return
  }
  func.func @transform_0(%arg0: i32, %arg1: i32) -> (i32, i32) {
    %c0_i32 = arith.constant 0 : i32
    return %arg0, %arg1 : i32, i32
  }
  func.func @transform_1(%arg0: i32, %arg1: i32) -> (i32, i32) {
    %c0_i32 = arith.constant 0 : i32
    %c0_i32_0 = arith.constant 0 : i32
    return %arg1, %c0_i32 : i32, i32
  }
  func.func @transform_2(%arg0: i32, %arg1: i32) -> (i32, i32) {
    %c0_i32 = arith.constant 0 : i32
    %c0_i32_0 = arith.constant 0 : i32
    return %arg0, %c0_i32 : i32, i32
  }
  func.func @transform_3(%arg0: i32, %arg1: i32) -> (i32, i32) {
    %c0_i32 = arith.constant 0 : i32
    %c0_i32_0 = arith.constant 0 : i32
    %c0_i32_1 = arith.constant 0 : i32
    return %c0_i32, %c0_i32_0 : i32, i32
  }
  func.func @transform_4(%arg0: i32, %arg1: i32) -> (i32, i32) {
    %c0_i32 = arith.constant 0 : i32
    %c0_i32_0 = arith.constant 0 : i32
    return %arg0, %c0_i32 : i32, i32
  }
}

</mosaic_0001>

<bundles_post_ra>
// kernel: gnn_forward.3
= control target key start
LH: loop header
LB: loop body
LE: loop exit
PB: predicated region body
PF: predicated region fallthrough
CT: control target
= control target key end

     0   :  { %v1239_v2 = vmov 0   ;;  %s1776_s1 = inlined_call_operand.vmem [shape: bf16[256,128], index: 1, kind: input, shape index: {}]   ;;  %s1777_s2 = inlined_call_operand.vmem [shape: f32[256,1], index: 2, kind: input, shape index: {}]   ;;  %s1778_s0 = inlined_call_operand.vmem [shape: bf16[256,256], index: 0, kind: input, shape index: {}]   ;;  %s1779_s3 = inlined_call_operand.vmem [shape: f32[1,128], index: 3, kind: input, shape index: {}]   ;;  %s1780_s4 = inlined_call_operand.vmem [shape: f32[256,128], index: 4, kind: output, shape index: {}]  }
   0x1   :  { %v1209_v0 = vld [vmem:[%s1776_s1 + $0x38] sm:$0xff]  ;;  %1236 = vset.pattern.permute.xlu1 %v1239_v2  ;;  %1235 = vset.pattern.permute.xlu0 %v1239_v2  ;;  %v1208_v3 = vld [vmem:[%s1776_s1 + $0x30] sm:$0xff]  ;;  %v650_v5 = vld [vmem:[%s1777_s2] sm:$0xff] }
   0x2   :  { %v1217_v1 = vld [vmem:[%s1776_s1 + $0x78] sm:$0xff]  ;;  %1237 = vset.pattern.permute.xlu2 %v1239_v2  ;;  %405 = vmatpush.bf16.msra.mxu0 %v1209_v0  ;;  %v652_v4 = vld [vmem:[%s1777_s2 + $0x10] sm:$0xff]  ;;  %v1207_v7 = vld [vmem:[%s1776_s1 + $0x28] sm:$0xff] }
   0x3   :  { %1218 = vmatpush.bf16.msra.mxu2 %v1209_v0  ;;  %494 = vmatpush.bf16.msra.mxu1 %v1217_v1  ;;  %v1216_v6 = vld [vmem:[%s1776_s1 + $0x70] sm:$0xff]  ;;  %v1215_v8 = vld [vmem:[%s1776_s1 + $0x68] sm:$0xff]  ;;  %v653_v9 = vld [vmem:[%s1777_s2 + $0x18] sm:$0xff] }
   0x4   :  { %1226 = vmatpush.bf16.msra.mxu3 %v1217_v1  ;;  %726 = vperm.xlu1 %1236, %v652_v4   ;;  %v651_v10 = vld [vmem:[%s1777_s2 + $0x8] sm:$0xff]  ;;  %v1206_v11 = vld [vmem:[%s1776_s1 + $0x20] sm:$0xff]  ;;  %v1205_v14 = vld [vmem:[%s1776_s1 + $0x18] sm:$0xff] }
   0x5   :  { %716 = vperm.xlu0 %1235, %v650_v5   ;;  %v654_v12 = vld [vmem:[%s1777_s2 + $0x20] sm:$0xff]  ;;  %v1213_v15 = vld [vmem:[%s1776_s1 + $0x58] sm:$0xff]  ;;  %v656_v17 = vld [vmem:[%s1777_s2 + $0x30] sm:$0xff] }
   0x6   :  { %406 = vmatpush.bf16.msra.mxu0 %v1208_v3  ;;  %v1214_v13 = vld [vmem:[%s1776_s1 + $0x60] sm:$0xff]  ;;  %736 = vperm.xlu2 %1237, %v654_v12   ;;  %v657_v16 = vld [vmem:[%s1777_s2 + $0x38] sm:$0xff]  ;;  %v1204_v18 = vld [vmem:[%s1776_s1 + $0x10] sm:$0xff] }
   0x7   :  { %1219 = vmatpush.bf16.msra.mxu2 %v1208_v3  ;;  %495 = vmatpush.bf16.msra.mxu1 %v1216_v6  ;;  %v655_v19 = vld [vmem:[%s1777_s2 + $0x28] sm:$0xff]  ;;  %v1212_v20 = vld [vmem:[%s1776_s1 + $0x50] sm:$0xff]  ;;  %v1202_v23 = vld [vmem:[%s1776_s1] sm:$0xff] }
   0x8   :  { %1227 = vmatpush.bf16.msra.mxu3 %v1216_v6  ;;  %v1203_v21 = vld [vmem:[%s1776_s1 + $0x8] sm:$0xff]  ;;  %v980_v24 = vld [vmem:[%s1778_s0] sm:$0xf]  ;;  %v660_v28 = vld [vmem:[%s1777_s2 + $0x50] sm:$0xff] }
   0x9   :  { %v1211_v22 = vld [vmem:[%s1776_s1 + $0x48] sm:$0xff]  ;;  %v1210_v26 = vld [vmem:[%s1776_s1 + $0x40] sm:$0xff]  ;;  %v661_v42 = vld [vmem:[%s1777_s2 + $0x58] sm:$0xff] }
   0xa   :  { %407 = vmatpush.bf16.msra.mxu0 %v1207_v7  ;;  %v1171_v25 = vld [vmem:[%s1778_s0 + $0x4] sm:$0xf0]  ;;  %v1044_v27 = vld [vmem:[%s1778_s0 + $0x80] sm:$0xf]  ;;  %v1170_v31 = vld [vmem:[%s1778_s0 + $0x4] sm:$0xf] }
   0xb   :  { %1220 = vmatpush.bf16.msra.mxu2 %v1207_v7  ;;  %496 = vmatpush.bf16.msra.mxu1 %v1215_v8  ;;  %v659_v29 = vld [vmem:[%s1777_s2 + $0x48] sm:$0xff]  ;;  %v658_v32 = vld [vmem:[%s1777_s2 + $0x40] sm:$0xff]  ;;  %v981_v36 = vor.u32 %v1171_v25, %v980_v24  ;;  %v988_v43 = vld [vmem:[%s1778_s0 + $0x10] sm:$0xf] }
   0xc   :  { %1228 = vmatpush.bf16.msra.mxu3 %v1215_v8  ;;  %731 = vperm.xlu1 %1236, %v653_v9   ;;  %v1187_v30 = vld [vmem:[%s1778_s0 + $0x84] sm:$0xf0]  ;;  %v982_v33 = vld [vmem:[%s1778_s0 + $0x8] sm:$0xf0]  ;;  %v1186_v34 = vld [vmem:[%s1778_s0 + $0x84] sm:$0xf] }
   0xd   :  { %721 = vperm.xlu0 %1235, %v651_v10   ;;  %v1046_v35 = vld [vmem:[%s1778_s0 + $0x88] sm:$0xf0]  ;;  %v1045_v37 = vor.u32 %v1187_v30, %v1044_v27  ;;  %v985_v38 = vor.u32 %v1170_v31, %v982_v33  ;;  %v662_v41 = vld [vmem:[%s1777_s2 + $0x60] sm:$0xff]  ;;  %v1173_v44 = vld [vmem:[%s1778_s0 + $0x14] sm:$0xf0] }
   0xe   :  { %408 = vmatpush.bf16.msra.mxu0 %v1206_v11  ;;  %741 = vperm.xlu2 %1237, %v655_v19   ;;  %v1049_v39 = vor.u32 %v1186_v34, %v1046_v35  ;;  %v663_v40 = vld [vmem:[%s1777_s2 + $0x68] sm:$0xff]  ;;  %v1052_v45 = vld [vmem:[%s1778_s0 + $0x90] sm:$0xf]  ;;  %v666_v46 = vld [vmem:[%s1777_s2 + $0x80] sm:$0xff]  ;;  %v989_v54 = vor.u32 %v1173_v44, %v988_v43 }
   0xf   :  { %1221 = vmatpush.bf16.msra.mxu2 %v1206_v11  ;;  %497 = vmatpush.bf16.msra.mxu1 %v1214_v13  ;;  %v665_v47 = vld [vmem:[%s1777_s2 + $0x78] sm:$0xff]  ;;  %v1172_v49 = vld [vmem:[%s1778_s0 + $0x14] sm:$0xf]  ;;  %v667_v60 = vld [vmem:[%s1777_s2 + $0x88] sm:$0xff] }
  0x10   :  { %1229 = vmatpush.bf16.msra.mxu3 %v1214_v13  ;;  %v1189_v48 = vld [vmem:[%s1778_s0 + $0x94] sm:$0xf0]  ;;  %v664_v50 = vld [vmem:[%s1777_s2 + $0x70] sm:$0xff]  ;;  %v990_v51 = vld [vmem:[%s1778_s0 + $0x18] sm:$0xf0] }
  0x11   :  { %v1188_v52 = vld [vmem:[%s1778_s0 + $0x94] sm:$0xf]  ;;  %v1054_v53 = vld [vmem:[%s1778_s0 + $0x98] sm:$0xf0]  ;;  %v1053_v55 = vor.u32 %v1189_v48, %v1052_v45  ;;  %v993_v56 = vor.u32 %v1172_v49, %v990_v51  ;;  %v996_v61 = vld [vmem:[%s1778_s0 + $0x20] sm:$0xf] }
  0x12   :  { %409 = vmatpush.bf16.msra.mxu0 %v1205_v14  ;;  %v1057_v57 = vor.u32 %v1188_v52, %v1054_v53  ;;  %v669_v58 = vld [vmem:[%s1777_s2 + $0x98] sm:$0xff]  ;;  %v668_v59 = vld [vmem:[%s1777_s2 + $0x90] sm:$0xff]  ;;  %v1175_v62 = vld [vmem:[%s1778_s0 + $0x24] sm:$0xf0] }
  0x13   :  { %1222 = vmatpush.bf16.msra.mxu2 %v1205_v14  ;;  %498 = vmatpush.bf16.msra.mxu1 %v1213_v15  ;;  %v672_v63 = vld [vmem:[%s1777_s2 + $0xb0] sm:$0xff]  ;;  %v671_v0 = vld [vmem:[%s1777_s2 + $0xa8] sm:$0xff]  ;;  %v1060_v1 = vld [vmem:[%s1778_s0 + $0xa0] sm:$0xf]  ;;  %v997_v7 = vor.u32 %v1175_v62, %v996_v61 }
  0x14   :  { %1230 = vmatpush.bf16.msra.mxu3 %v1213_v15  ;;  %751 = vperm.xlu1 %1236, %v657_v16   ;;  %v1191_v2 = vld [vmem:[%s1778_s0 + $0xa4] sm:$0xf0]  ;;  %v1174_v3 = vld [vmem:[%s1778_s0 + $0x24] sm:$0xf]  ;;  %v998_v4 = vld [vmem:[%s1778_s0 + $0x28] sm:$0xf0] }
  0x15   :  { %746 = vperm.xlu0 %1235, %v656_v17   ;;  %v1190_v5 = vld [vmem:[%s1778_s0 + $0xa4] sm:$0xf]  ;;  %v1062_v6 = vld [vmem:[%s1778_s0 + $0xa8] sm:$0xf0]  ;;  %v1061_v8 = vor.u32 %v1191_v2, %v1060_v1  ;;  %v1001_v9 = vor.u32 %v1174_v3, %v998_v4  ;;  %v1004_v14 = vld [vmem:[%s1778_s0 + $0x30] sm:$0xf] }
  0x16   :  { %410 = vmatpush.bf16.msra.mxu0 %v1204_v18  ;;  %756 = vperm.xlu2 %1237, %v658_v32   ;;  %v1065_v10 = vor.u32 %v1190_v5, %v1062_v6  ;;  %v675_v11 = vld [vmem:[%s1777_s2 + $0xc8] sm:$0xff]  ;;  %v674_v12 = vld [vmem:[%s1777_s2 + $0xc0] sm:$0xff]  ;;  %v673_v15 = vld [vmem:[%s1777_s2 + $0xb8] sm:$0xff] }
  0x17   :  { %1223 = vmatpush.bf16.msra.mxu2 %v1204_v18  ;;  %499 = vmatpush.bf16.msra.mxu1 %v1212_v20  ;;  %v670_v13 = vld [vmem:[%s1777_s2 + $0xa0] sm:$0xff]  ;;  %v1177_v16 = vld [vmem:[%s1778_s0 + $0x34] sm:$0xf0]  ;;  %v1068_v19 = vld [vmem:[%s1778_s0 + $0xb0] sm:$0xf] }
  0x18   :  { %1231 = vmatpush.bf16.msra.mxu3 %v1212_v20  ;;  %v678_v17 = vld [vmem:[%s1777_s2 + $0xe0] sm:$0xff]  ;;  %v677_v18 = vld [vmem:[%s1777_s2 + $0xd8] sm:$0xff]  ;;  %v1005_v25 = vor.u32 %v1177_v16, %v1004_v14  ;;  %v680_v30 = vld [vmem:[%s1777_s2 + $0xf0] sm:$0xff] }
  0x19   :  { %v1193_v20 = vld [vmem:[%s1778_s0 + $0xb4] sm:$0xf0]  ;;  %v1070_v24 = vld [vmem:[%s1778_s0 + $0xb8] sm:$0xf0]  ;;  %v676_v31 = vld [vmem:[%s1777_s2 + $0xd0] sm:$0xff] }
  0x1a   :  { %411 = vmatpush.bf16.msra.mxu0 %v1203_v21  ;;  %v679_v32 = vld [vmem:[%s1777_s2 + $0xe8] sm:$0xff]  ;;  %v1012_v33 = vld [vmem:[%s1778_s0 + $0x40] sm:$0xf]  ;;  %v1020_v45 = vld [vmem:[%s1778_s0 + $0x50] sm:$0xf] }
  0x1b   :  { %1224 = vmatpush.bf16.msra.mxu2 %v1203_v21  ;;  %500 = vmatpush.bf16.msra.mxu1 %v1211_v22  ;;  %v1176_v21 = vld [vmem:[%s1778_s0 + $0x34] sm:$0xf]  ;;  %v1179_v34 = vld [vmem:[%s1778_s0 + $0x44] sm:$0xf0]  ;;  %v1076_v35 = vld [vmem:[%s1778_s0 + $0xc0] sm:$0xf] }
  0x1c   :  { %1232 = vmatpush.bf16.msra.mxu3 %v1211_v22  ;;  %766 = vperm.xlu1 %1236, %v660_v28   ;;  %v1006_v22 = vld [vmem:[%s1778_s0 + $0x38] sm:$0xf0]  ;;  %v1197_v48 = vld [vmem:[%s1778_s0 + $0xd4] sm:$0xf0]  ;;  %v1180_v49 = vld [vmem:[%s1778_s0 + $0x54] sm:$0xf] }
  0x1d   :  { %761 = vperm.xlu0 %1235, %v659_v29   ;;  %v1009_v27 = vor.u32 %v1176_v21, %v1006_v22  ;;  %v681_v29 = vld [vmem:[%s1777_s2 + $0xf8] sm:$0xff]  ;;  %v1196_v51 = vld [vmem:[%s1778_s0 + $0xd4] sm:$0xf]  ;;  %v1199_v61 = vld [vmem:[%s1778_s0 + $0xe4] sm:$0xf0] }
  0x1e   :  { %412 = vmatpush.bf16.msra.mxu0 %v1202_v23  ;;  %771 = vperm.xlu2 %1237, %v661_v42   ;;  %v1086_v52 = vld [vmem:[%s1778_s0 + $0xd8] sm:$0xf0]  ;;  %v1182_v62 = vld [vmem:[%s1778_s0 + $0x64] sm:$0xf]  ;;  %v1030_v1 = vld [vmem:[%s1778_s0 + $0x68] sm:$0xf0] }
  0x1f   :  { %1225 = vmatpush.bf16.msra.mxu2 %v1202_v23  ;;  %501 = vmatpush.bf16.msra.mxu1 %v1210_v26  ;;  %v1192_v23 = vld [vmem:[%s1778_s0 + $0xb4] sm:$0xf]  ;;  %v1198_v2 = vld [vmem:[%s1778_s0 + $0xe4] sm:$0xf]  ;;  %v1094_v3 = vld [vmem:[%s1778_s0 + $0xe8] sm:$0xf0]  ;;  %v1033_v6 = vor.u32 %v1182_v62, %v1030_v1 }
  0x20   :  { %1233 = vmatpush.bf16.msra.mxu3 %v1210_v26  ;;  %v1069_v26 = vor.u32 %v1193_v20, %v1068_v19  ;;  %v1073_v28 = vor.u32 %v1192_v23, %v1070_v24  ;;  %v1100_v14 = vld [vmem:[%s1778_s0 + $0xf0] sm:$0xf]  ;;  %v1184_v16 = vld [vmem:[%s1778_s0 + $0x74] sm:$0xf]  ;;  %v1102_v19 = vld [vmem:[%s1778_s0 + $0xf8] sm:$0xf0] }
  0x21   :  { %413 = vmatmul.bf16.vlgmr.msra.gmra.mxu0 %v981_v36  ;;  %v1195_v36 = vld [vmem:[%s1778_s0 + $0xc4] sm:$0xf0] }
  0x22   :  { %453 = vmatmul.bf16.vlgmr.msra.gmra.mxu2 %v1045_v37  ;;  %502 = vmatmul.bf16.vlgmr.msra.gmra.mxu1 %v985_v38  ;;  %v1178_v37 = vld [vmem:[%s1778_s0 + $0x44] sm:$0xf]  ;;  %v1014_v38 = vld [vmem:[%s1778_s0 + $0x48] sm:$0xf0]  ;;  %v1077_v42 = vor.u32 %v1195_v36, %v1076_v35 }
  0x23   :  { %542 = vmatmul.bf16.vlgmr.msra.gmra.mxu3 %v1049_v39  ;;  %v1194_v39 = vld [vmem:[%s1778_s0 + $0xc4] sm:$0xf]  ;;  %v1017_v43 = vor.u32 %v1178_v37, %v1014_v38 }
  0x24   :  { %781 = vperm.xlu1 %1236, %v663_v40   ;;  %v1078_v40 = vld [vmem:[%s1778_s0 + $0xc8] sm:$0xf0] }
  0x25   :  { %776 = vperm.xlu0 %1235, %v662_v41   ;;  %v1013_v41 = vor.u32 %v1179_v34, %v1012_v33  ;;  %v1081_v44 = vor.u32 %v1194_v39, %v1078_v40  ;;  %v1626_v33 = vld [vmem:[%s1779_s3] ss:$0 sm:$0xff] }
  0x26   :  { %786 = vperm.xlu2 %1237, %v664_v50   ;;  %v1022_v50 = vld [vmem:[%s1778_s0 + $0x58] sm:$0xf0] }
  0x2c   :  { %796 = vperm.xlu1 %1236, %v666_v46   ;;  %v1181_v46 = vld [vmem:[%s1778_s0 + $0x54] sm:$0xf0] }
  0x2d   :  { %791 = vperm.xlu0 %1235, %v665_v47   ;;  %v1084_v47 = vld [vmem:[%s1778_s0 + $0xd0] sm:$0xf]  ;;  %v1021_v53 = vor.u32 %v1181_v46, %v1020_v45 }
  0x2e   :  { %801 = vperm.xlu2 %1237, %v667_v60   ;;  %v1092_v60 = vld [vmem:[%s1778_s0 + $0xe0] sm:$0xf] }
  0x2f   :  { %v1093_v5 = vor.u32 %v1199_v61, %v1092_v60 }
  0x31   :  { %418 = vmatmul.bf16.gmra.mxu0 %v989_v54  ;;  %v1085_v54 = vor.u32 %v1197_v48, %v1084_v47 }
  0x32   :  { %458 = vmatmul.bf16.gmra.mxu2 %v1053_v55  ;;  %507 = vmatmul.bf16.gmra.mxu1 %v993_v56  ;;  %v1025_v55 = vor.u32 %v1180_v49, %v1022_v50  ;;  %v1089_v56 = vor.u32 %v1196_v51, %v1086_v52 }
  0x33   :  { %547 = vmatmul.bf16.gmra.mxu3 %v1057_v57 }
  0x34   :  { %811 = vperm.xlu1 %1236, %v669_v58   ;;  %v1028_v58 = vld [vmem:[%s1778_s0 + $0x60] sm:$0xf] }
  0x35   :  { %806 = vperm.xlu0 %1235, %v668_v59   ;;  %v1183_v59 = vld [vmem:[%s1778_s0 + $0x64] sm:$0xf0] }
  0x36   :  { %816 = vperm.xlu2 %1237, %v670_v13   ;;  %v1029_v4 = vor.u32 %v1183_v59, %v1028_v58  ;;  %v1185_v13 = vld [vmem:[%s1778_s0 + $0x74] sm:$0xf0] }
  0x3c   :  { %826 = vperm.xlu1 %1236, %v672_v63  }
  0x3d   :  { %821 = vperm.xlu0 %1235, %v671_v0  }
  0x3e   :  { %831 = vperm.xlu2 %1237, %v673_v15   ;;  %v1201_v15 = vld [vmem:[%s1778_s0 + $0xf4] sm:$0xf0] }
  0x3f   :  { %v1101_v21 = vor.u32 %v1201_v15, %v1100_v14 }
  0x41   :  { %423 = vmatmul.bf16.gmra.mxu0 %v997_v7  ;;  %v1097_v7 = vor.u32 %v1198_v2, %v1094_v3 }
  0x42   :  { %463 = vmatmul.bf16.gmra.mxu2 %v1061_v8  ;;  %512 = vmatmul.bf16.gmra.mxu1 %v1001_v9 }
  0x43   :  { %552 = vmatmul.bf16.gmra.mxu3 %v1065_v10 }
  0x44   :  { %841 = vperm.xlu1 %1236, %v675_v11  }
  0x45   :  { %836 = vperm.xlu0 %1235, %v674_v12   ;;  %v1036_v12 = vld [vmem:[%s1778_s0 + $0x70] sm:$0xf] }
  0x46   :  { %846 = vperm.xlu2 %1237, %v676_v31   ;;  %v1037_v20 = vor.u32 %v1185_v13, %v1036_v12 }
  0x4c   :  { %856 = vperm.xlu1 %1236, %v678_v17   ;;  %v1038_v17 = vld [vmem:[%s1778_s0 + $0x78] sm:$0xf0] }
  0x4d   :  { %851 = vperm.xlu0 %1235, %v677_v18   ;;  %v1200_v18 = vld [vmem:[%s1778_s0 + $0xf4] sm:$0xf]  ;;  %v1041_v22 = vor.u32 %v1184_v16, %v1038_v17 }
  0x4e   :  { %861 = vperm.xlu2 %1237, %v679_v32   ;;  %v1105_v23 = vor.u32 %v1200_v18, %v1102_v19 }
  0x51   :  { %428 = vmatmul.bf16.gmra.mxu0 %v1005_v25 }
  0x52   :  { %468 = vmatmul.bf16.gmra.mxu2 %v1069_v26  ;;  %517 = vmatmul.bf16.gmra.mxu1 %v1009_v27 }
  0x53   :  { %557 = vmatmul.bf16.gmra.mxu3 %v1073_v28 }
  0x54   :  { %871 = vperm.xlu1 %1236, %v681_v29  }
  0x55   :  { %866 = vperm.xlu0 %1235, %v680_v30  }
  0x60   :  { %v1570_v63 = vpop.permute.xlu2 %736 }
  0x61   :  { %433 = vmatmul.bf16.gmra.mxu0 %v1013_v41 }
  0x62   :  { %473 = vmatmul.bf16.gmra.mxu2 %v1077_v42  ;;  %522 = vmatmul.bf16.gmra.mxu1 %v1017_v43 }
  0x63   :  { %562 = vmatmul.bf16.gmra.mxu3 %v1081_v44 }
  0x68   :  { %v1583_v9 = vpop.permute.xlu2 %741 }
  0x70   :  { %v1611_v24 = vpop.permute.xlu2 %756 }
  0x71   :  { %438 = vmatmul.bf16.gmra.mxu0 %v1021_v53 }
  0x72   :  { %478 = vmatmul.bf16.gmra.mxu2 %v1085_v54  ;;  %527 = vmatmul.bf16.gmra.mxu1 %v1025_v55 }
  0x73   :  { %567 = vmatmul.bf16.gmra.mxu3 %v1089_v56 }
  0x76   :  { %v1553_v57 = vpop.permute.xlu1 %726 }
  0x77   :  { %v717_v0 = vpop.permute.xlu0 %716 }
  0x78   :  { %v1617_v27 = vpop.permute.xlu2 %771 }
  0x7e   :  { %v1581_v8 = vpop.permute.xlu1 %731 }
  0x7f   :  { %v722_v10 = vpop.permute.xlu0 %721 }
  0x80   :  { %v1628_v35 = vpop.permute.xlu2 %786 }
  0x81   :  { %443 = vmatmul.bf16.gmra.mxu0 %v1029_v4 }
  0x82   :  { %483 = vmatmul.bf16.gmra.mxu2 %v1093_v5  ;;  %532 = vmatmul.bf16.gmra.mxu1 %v1033_v6 }
  0x83   :  { %572 = vmatmul.bf16.gmra.mxu3 %v1097_v7 }
  0x86   :  { %v1585_v11 = vpop.permute.xlu1 %751 }
  0x87   :  { %v1613_v25 = vpop.permute.xlu0 %746 }
  0x88   :  { %v802_v50 = vpop.permute.xlu2 %801 }
  0x8e   :  { %v1615_v26 = vpop.permute.xlu1 %766 }
  0x8f   :  { %v1619_v28 = vpop.permute.xlu0 %761 }
  0x91   :  { %448 = vmatmul.bf16.gmra.mxu0 %v1037_v20 }
  0x92   :  { %488 = vmatmul.bf16.gmra.mxu2 %v1101_v21  ;;  %537 = vmatmul.bf16.gmra.mxu1 %v1041_v22 }
  0x93   :  { %577 = vmatmul.bf16.gmra.mxu3 %v1105_v23 }
  0x96   :  { %v1621_v29 = vpop.permute.xlu1 %781 }
  0x97   :  { %v1630_v36 = vpop.permute.xlu0 %776 }
  0x9e   :  { %v414_v30 = vpop.f32.mrf.mxu0  ;;  %v797_v40 = vpop.permute.xlu1 %796 }
  0x9f   :  { %v503_v31 = vpop.f32.mrf.mxu1  ;;  %v1641_v51 = vpop.permute.xlu0 %791 }
  0xa0   :  { %v504_v32 = vadd.f32 %v503_v31, %v414_v30 }
  0xa2   :  { %v874_v34 = vmul.f32 %v717_v0, %v504_v32  ;;  %v817_v32 = vpop.permute.xlu2 %816 }
  0xa4   :  { %v910_v37 = vadd.f32 %v1626_v33, %v874_v34 }
  0xa5   :  { %v454_v38 = vpop.f32.mrf.mxu2 }
  0xa6   :  { %v543_v39 = vpop.f32.mrf.mxu3  ;;  %942 = vst [vmem:[%s1780_s4] sm:$0xff] %v910_v37  ;;  %v416_v42 = vpop.f32.mrf.mxu0 }
  0xa7   :  { %v544_v41 = vadd.f32 %v543_v39, %v454_v38  ;;  %v505_v43 = vpop.f32.mrf.mxu1  ;;  %v807_v3 = vpop.permute.xlu0 %806 }
  0xa8   :  { %v506_v45 = vadd.f32 %v505_v43, %v416_v42  ;;  %v812_v16 = vpop.permute.xlu1 %811 }
  0xa9   :  { %v890_v44 = vmul.f32 %v797_v40, %v544_v41 }
  0xaa   :  { %v875_v47 = vmul.f32 %v722_v10, %v506_v45 }
  0xab   :  { %v926_v46 = vadd.f32 %v1626_v33, %v890_v44 }
  0xac   :  { %v911_v48 = vadd.f32 %v1626_v33, %v875_v47 }
  0xad   :  { %958 = vst [vmem:[%s1780_s4 + $0x80] sm:$0xff] %v926_v46  ;;  %v456_v49 = vpop.f32.mrf.mxu2 }
  0xae   :  { %v545_v52 = vpop.f32.mrf.mxu3  ;;  %943 = vst [vmem:[%s1780_s4 + $0x8] sm:$0xff] %v911_v48  ;;  %v419_v54 = vpop.f32.mrf.mxu0 }
  0xaf   :  { %v546_v53 = vadd.f32 %v545_v52, %v456_v49  ;;  %v508_v55 = vpop.f32.mrf.mxu1  ;;  %v822_v45 = vpop.permute.xlu0 %821 }
  0xb0   :  { %v509_v58 = vadd.f32 %v508_v55, %v419_v54 }
  0xb1   :  { %v891_v56 = vmul.f32 %v802_v50, %v546_v53 }
  0xb2   :  { %v876_v60 = vmul.f32 %v1553_v57, %v509_v58 }
  0xb3   :  { %v927_v59 = vadd.f32 %v1626_v33, %v891_v56  ;;  %v827_v56 = vpop.permute.xlu1 %826 }
  0xb4   :  { %v912_v61 = vadd.f32 %v1626_v33, %v876_v60 }
  0xb5   :  { %959 = vst [vmem:[%s1780_s4 + $0x88] sm:$0xff] %v927_v59  ;;  %v459_v62 = vpop.f32.mrf.mxu2 }
  0xb6   :  { %v548_v0 = vpop.f32.mrf.mxu3  ;;  %944 = vst [vmem:[%s1780_s4 + $0x10] sm:$0xff] %v912_v61  ;;  %v421_v2 = vpop.f32.mrf.mxu0 }
  0xb7   :  { %v549_v1 = vadd.f32 %v548_v0, %v459_v62  ;;  %v510_v4 = vpop.f32.mrf.mxu1 }
  0xb8   :  { %v511_v6 = vadd.f32 %v510_v4, %v421_v2  ;;  %v832_v4 = vpop.permute.xlu2 %831 }
  0xb9   :  { %v892_v5 = vmul.f32 %v807_v3, %v549_v1 }
  0xba   :  { %v877_v7 = vmul.f32 %v1581_v8, %v511_v6 }
  0xbb   :  { %v928_v57 = vadd.f32 %v1626_v33, %v892_v5 }
  0xbc   :  { %v913_v10 = vadd.f32 %v1626_v33, %v877_v7 }
  0xbd   :  { %960 = vst [vmem:[%s1780_s4 + $0x90] sm:$0xff] %v928_v57  ;;  %v461_v12 = vpop.f32.mrf.mxu2 }
  0xbe   :  { %v550_v13 = vpop.f32.mrf.mxu3  ;;  %945 = vst [vmem:[%s1780_s4 + $0x18] sm:$0xff] %v913_v10  ;;  %v424_v15 = vpop.f32.mrf.mxu0 }
  0xbf   :  { %v551_v14 = vadd.f32 %v550_v13, %v461_v12  ;;  %v513_v17 = vpop.f32.mrf.mxu1 }
  0xc0   :  { %v514_v19 = vadd.f32 %v513_v17, %v424_v15 }
  0xc1   :  { %v893_v18 = vmul.f32 %v812_v16, %v551_v14  ;;  %v837_v16 = vpop.permute.xlu0 %836 }
  0xc2   :  { %v878_v20 = vmul.f32 %v1570_v63, %v514_v19 }
  0xc3   :  { %v929_v8 = vadd.f32 %v1626_v33, %v893_v18 }
  0xc4   :  { %v914_v21 = vadd.f32 %v1626_v33, %v878_v20 }
  0xc5   :  { %961 = vst [vmem:[%s1780_s4 + $0x98] sm:$0xff] %v929_v8  ;;  %v464_v22 = vpop.f32.mrf.mxu2 }
  0xc6   :  { %v553_v23 = vpop.f32.mrf.mxu3  ;;  %946 = vst [vmem:[%s1780_s4 + $0x20] sm:$0xff] %v914_v21  ;;  %v426_v31 = vpop.f32.mrf.mxu0 }
  0xc7   :  { %v554_v30 = vadd.f32 %v553_v23, %v464_v22  ;;  %v515_v34 = vpop.f32.mrf.mxu1 }
  0xc8   :  { %v516_v38 = vadd.f32 %v515_v34, %v426_v31  ;;  %v842_v31 = vpop.permute.xlu1 %841 }
  0xc9   :  { %v894_v37 = vmul.f32 %v817_v32, %v554_v30 }
  0xca   :  { %v879_v39 = vmul.f32 %v1583_v9, %v516_v38 }
  0xcb   :  { %v930_v63 = vadd.f32 %v1626_v33, %v894_v37 }
  0xcc   :  { %v915_v40 = vadd.f32 %v1626_v33, %v879_v39 }
  0xcd   :  { %962 = vst [vmem:[%s1780_s4 + $0xa0] sm:$0xff] %v930_v63  ;;  %v466_v41 = vpop.f32.mrf.mxu2 }
  0xce   :  { %v555_v42 = vpop.f32.mrf.mxu3  ;;  %947 = vst [vmem:[%s1780_s4 + $0x28] sm:$0xff] %v915_v40  ;;  %v429_v44 = vpop.f32.mrf.mxu0 }
  0xcf   :  { %v556_v43 = vadd.f32 %v555_v42, %v466_v41  ;;  %v518_v46 = vpop.f32.mrf.mxu1 }
  0xd0   :  { %v519_v48 = vadd.f32 %v518_v46, %v429_v44 }
  0xd1   :  { %v895_v47 = vmul.f32 %v822_v45, %v556_v43  ;;  %v847_v43 = vpop.permute.xlu2 %846 }
  0xd2   :  { %v880_v49 = vmul.f32 %v1613_v25, %v519_v48 }
  0xd3   :  { %v931_v9 = vadd.f32 %v1626_v33, %v895_v47 }
  0xd4   :  { %v916_v50 = vadd.f32 %v1626_v33, %v880_v49 }
  0xd5   :  { %963 = vst [vmem:[%s1780_s4 + $0xa8] sm:$0xff] %v931_v9  ;;  %v469_v52 = vpop.f32.mrf.mxu2 }
  0xd6   :  { %v558_v53 = vpop.f32.mrf.mxu3  ;;  %948 = vst [vmem:[%s1780_s4 + $0x30] sm:$0xff] %v916_v50  ;;  %v431_v55 = vpop.f32.mrf.mxu0 }
  0xd7   :  { %v559_v54 = vadd.f32 %v558_v53, %v469_v52  ;;  %v520_v58 = vpop.f32.mrf.mxu1  ;;  %v852_v53 = vpop.permute.xlu0 %851 }
  0xd8   :  { %v521_v60 = vadd.f32 %v520_v58, %v431_v55 }
  0xd9   :  { %v896_v59 = vmul.f32 %v827_v56, %v559_v54 }
  0xda   :  { %v881_v61 = vmul.f32 %v1585_v11, %v521_v60 }
  0xdb   :  { %v932_v25 = vadd.f32 %v1626_v33, %v896_v59 }
  0xdc   :  { %v917_v62 = vadd.f32 %v1626_v33, %v881_v61 }
  0xdd   :  { %964 = vst [vmem:[%s1780_s4 + $0xb0] sm:$0xff] %v932_v25  ;;  %v471_v0 = vpop.f32.mrf.mxu2 }
  0xde   :  { %v560_v1 = vpop.f32.mrf.mxu3  ;;  %949 = vst [vmem:[%s1780_s4 + $0x38] sm:$0xff] %v917_v62  ;;  %v434_v3 = vpop.f32.mrf.mxu0 }
  0xdf   :  { %v561_v2 = vadd.f32 %v560_v1, %v471_v0  ;;  %v523_v5 = vpop.f32.mrf.mxu1  ;;  %v857_v0 = vpop.permute.xlu1 %856 }
  0xe0   :  { %v524_v57 = vadd.f32 %v523_v5, %v434_v3 }
  0xe1   :  { %v897_v6 = vmul.f32 %v832_v4, %v561_v2 }
  0xe2   :  { %v882_v7 = vmul.f32 %v1611_v24, %v524_v57 }
  0xe3   :  { %v933_v11 = vadd.f32 %v1626_v33, %v897_v6 }
  0xe4   :  { %v918_v10 = vadd.f32 %v1626_v33, %v882_v7 }
  0xe5   :  { %965 = vst [vmem:[%s1780_s4 + $0xb8] sm:$0xff] %v933_v11  ;;  %v474_v12 = vpop.f32.mrf.mxu2 }
  0xe6   :  { %v563_v13 = vpop.f32.mrf.mxu3  ;;  %950 = vst [vmem:[%s1780_s4 + $0x40] sm:$0xff] %v918_v10  ;;  %v436_v15 = vpop.f32.mrf.mxu0 }
  0xe7   :  { %v564_v14 = vadd.f32 %v563_v13, %v474_v12  ;;  %v525_v17 = vpop.f32.mrf.mxu1  ;;  %v862_v10 = vpop.permute.xlu2 %861 }
  0xe8   :  { %v526_v19 = vadd.f32 %v525_v17, %v436_v15 }
  0xe9   :  { %v898_v18 = vmul.f32 %v837_v16, %v564_v14 }
  0xea   :  { %v883_v8 = vmul.f32 %v1619_v28, %v526_v19 }
  0xeb   :  { %v934_v24 = vadd.f32 %v1626_v33, %v898_v18 }
  0xec   :  { %v919_v20 = vadd.f32 %v1626_v33, %v883_v8  ;;  %v867_v8 = vpop.permute.xlu0 %866 }
  0xed   :  { %966 = vst [vmem:[%s1780_s4 + $0xc0] sm:$0xff] %v934_v24  ;;  %v476_v21 = vpop.f32.mrf.mxu2 }
  0xee   :  { %v565_v22 = vpop.f32.mrf.mxu3  ;;  %951 = vst [vmem:[%s1780_s4 + $0x48] sm:$0xff] %v919_v20  ;;  %v439_v30 = vpop.f32.mrf.mxu0 }
  0xef   :  { %v566_v23 = vadd.f32 %v565_v22, %v476_v21  ;;  %v528_v32 = vpop.f32.mrf.mxu1 }
  0xf0   :  { %v529_v37 = vadd.f32 %v528_v32, %v439_v30 }
  0xf1   :  { %v899_v34 = vmul.f32 %v842_v31, %v566_v23 }
  0xf2   :  { %v884_v38 = vmul.f32 %v1615_v26, %v529_v37  ;;  %v872_v37 = vpop.permute.xlu1 %871 }
  0xf3   :  { %v935_v28 = vadd.f32 %v1626_v33, %v899_v34 }
  0xf4   :  { %v920_v63 = vadd.f32 %v1626_v33, %v884_v38 }
  0xf5   :  { %967 = vst [vmem:[%s1780_s4 + $0xc8] sm:$0xff] %v935_v28  ;;  %v479_v39 = vpop.f32.mrf.mxu2 }
  0xf6   :  { %v568_v40 = vpop.f32.mrf.mxu3  ;;  %952 = vst [vmem:[%s1780_s4 + $0x50] sm:$0xff] %v920_v63  ;;  %v441_v42 = vpop.f32.mrf.mxu0 }
  0xf7   :  { %v569_v41 = vadd.f32 %v568_v40, %v479_v39  ;;  %v530_v44 = vpop.f32.mrf.mxu1 }
  0xf8   :  { %v531_v46 = vadd.f32 %v530_v44, %v441_v42 }
  0xf9   :  { %v900_v45 = vmul.f32 %v847_v43, %v569_v41 }
  0xfa   :  { %v885_v47 = vmul.f32 %v1617_v27, %v531_v46 }
  0xfb   :  { %v936_v26 = vadd.f32 %v1626_v33, %v900_v45 }
  0xfc   :  { %v921_v48 = vadd.f32 %v1626_v33, %v885_v47 }
  0xfd   :  { %968 = vst [vmem:[%s1780_s4 + $0xd0] sm:$0xff] %v936_v26  ;;  %v481_v9 = vpop.f32.mrf.mxu2 }
  0xfe   :  { %v570_v49 = vpop.f32.mrf.mxu3  ;;  %953 = vst [vmem:[%s1780_s4 + $0x58] sm:$0xff] %v921_v48  ;;  %v444_v52 = vpop.f32.mrf.mxu0 }
  0xff   :  { %v571_v50 = vadd.f32 %v570_v49, %v481_v9  ;;  %v533_v54 = vpop.f32.mrf.mxu1 }
 0x100   :  { %v534_v56 = vadd.f32 %v533_v54, %v444_v52 }
 0x101   :  { %v901_v55 = vmul.f32 %v852_v53, %v571_v50 }
 0x102   :  { %v886_v58 = vmul.f32 %v1630_v36, %v534_v56 }
 0x103   :  { %v937_v27 = vadd.f32 %v1626_v33, %v901_v55 }
 0x104   :  { %v922_v59 = vadd.f32 %v1626_v33, %v886_v58 }
 0x105   :  { %969 = vst [vmem:[%s1780_s4 + $0xd8] sm:$0xff] %v937_v27  ;;  %v484_v60 = vpop.f32.mrf.mxu2 }
 0x106   :  { %v573_v25 = vpop.f32.mrf.mxu3  ;;  %954 = vst [vmem:[%s1780_s4 + $0x60] sm:$0xff] %v922_v59  ;;  %v446_v62 = vpop.f32.mrf.mxu0 }
 0x107   :  { %v574_v61 = vadd.f32 %v573_v25, %v484_v60  ;;  %v535_v1 = vpop.f32.mrf.mxu1 }
 0x108   :  { %v536_v3 = vadd.f32 %v535_v1, %v446_v62 }
 0x109   :  { %v902_v2 = vmul.f32 %v857_v0, %v574_v61 }
 0x10a   :  { %v887_v4 = vmul.f32 %v1621_v29, %v536_v3 }
 0x10b   :  { %v938_v36 = vadd.f32 %v1626_v33, %v902_v2 }
 0x10c   :  { %v923_v5 = vadd.f32 %v1626_v33, %v887_v4 }
 0x10d   :  { %970 = vst [vmem:[%s1780_s4 + $0xe0] sm:$0xff] %v938_v36  ;;  %v486_v6 = vpop.f32.mrf.mxu2 }
 0x10e   :  { %v575_v57 = vpop.f32.mrf.mxu3  ;;  %955 = vst [vmem:[%s1780_s4 + $0x68] sm:$0xff] %v923_v5  ;;  %v449_v7 = vpop.f32.mrf.mxu0 }
 0x10f   :  { %v576_v11 = vadd.f32 %v575_v57, %v486_v6  ;;  %v538_v12 = vpop.f32.mrf.mxu1 }
 0x110   :  { %v539_v14 = vadd.f32 %v538_v12, %v449_v7 }
 0x111   :  { %v903_v13 = vmul.f32 %v862_v10, %v576_v11 }
 0x112   :  { %v888_v15 = vmul.f32 %v1628_v35, %v539_v14 }
 0x113   :  { %v939_v29 = vadd.f32 %v1626_v33, %v903_v13 }
 0x114   :  { %v924_v16 = vadd.f32 %v1626_v33, %v888_v15 }
 0x115   :  { %971 = vst [vmem:[%s1780_s4 + $0xe8] sm:$0xff] %v939_v29  ;;  %v489_v17 = vpop.f32.mrf.mxu2 }
 0x116   :  { %v578_v18 = vpop.f32.mrf.mxu3  ;;  %956 = vst [vmem:[%s1780_s4 + $0x70] sm:$0xff] %v924_v16  ;;  %v451_v24 = vpop.f32.mrf.mxu0 }
 0x117   :  { %v579_v19 = vadd.f32 %v578_v18, %v489_v17  ;;  %v540_v20 = vpop.f32.mrf.mxu1 }
 0x118   :  { %v541_v22 = vadd.f32 %v540_v20, %v451_v24 }
 0x119   :  { %v904_v21 = vmul.f32 %v867_v8, %v579_v19 }
 0x11a   :  { %v889_v23 = vmul.f32 %v1641_v51, %v541_v22 }
 0x11b   :  { %v940_v35 = vadd.f32 %v1626_v33, %v904_v21 }
 0x11c   :  { %v925_v30 = vadd.f32 %v1626_v33, %v889_v23 }
 0x11d   :  { %972 = vst [vmem:[%s1780_s4 + $0xf0] sm:$0xff] %v940_v35  ;;  %v491_v31 = vpop.f32.mrf.mxu2 }
 0x11e   :  { %v580_v32 = vpop.f32.mrf.mxu3  ;;  %957 = vst [vmem:[%s1780_s4 + $0x78] sm:$0xff] %v925_v30 }
 0x11f   :  { %v581_v34 = vadd.f32 %v580_v32, %v491_v31 }
 0x121   :  { %v905_v28 = vmul.f32 %v872_v37, %v581_v34 }
 0x123   :  { %v941_v38 = vadd.f32 %v1626_v33, %v905_v28 }
 0x125   :  { %973 = vst [vmem:[%s1780_s4 + $0xf8] sm:$0xff] %v941_v38 }

// kernel: gnn_forward.2
= control target key start
LH: loop header
LB: loop body
LE: loop exit
PB: predicated region body
PF: predicated region fallthrough
CT: control target
= control target key end

     0   :  { %v1650_v0 = vmov 0   ;;  %s2310_s2 = inlined_call_operand.vmem [shape: f32[256,1], index: 2, kind: input, shape index: {}]   ;;  %s2311_s1 = inlined_call_operand.vmem [shape: bf16[256,128], index: 1, kind: input, shape index: {}]   ;;  %s2312_s0 = inlined_call_operand.vmem [shape: bf16[256,256], index: 0, kind: input, shape index: {}]   ;;  %s2313_s3 = inlined_call_operand.vmem [shape: f32[1,128], index: 3, kind: input, shape index: {}]   ;;  %s2314_s4 = inlined_call_operand.vmem [shape: bf16[128,128], index: 4, kind: input, shape index: {}]   ;;  %s2315_s5 = inlined_call_operand.vmem [shape: bf16[256,128], index: 5, kind: output, shape index: {}]  }
   0x1   :  { %1647 = vset.pattern.permute.xlu1 %v1650_v0  ;;  %1646 = vset.pattern.permute.xlu0 %v1650_v0  ;;  %v655_v1 = vld [vmem:[%s2310_s2 + $0x10] sm:$0xff]  ;;  %v653_v2 = vld [vmem:[%s2310_s2] sm:$0xff]  ;;  %v1509_v3 = vld [vmem:[%s2311_s1 + $0x38] sm:$0xff] }
   0x2   :  { %729 = vperm.xlu1 %1647, %v655_v1   ;;  %719 = vperm.xlu0 %1646, %v653_v2   ;;  %v1693_v4 = vld [vmem:[%s2311_s1 + $0x78] sm:$0xff]  ;;  %v1508_v5 = vld [vmem:[%s2311_s1 + $0x30] sm:$0xff]  ;;  %v654_v8 = vld [vmem:[%s2310_s2 + $0x8] sm:$0xff] }
   0x3   :  { %408 = vmatpush.bf16.msra.mxu0 %v1509_v3  ;;  %1621 = vmatpush.bf16.msra.mxu3 %v1509_v3  ;;  %v1702_v6 = vld [vmem:[%s2311_s1 + $0x70] sm:$0xff]  ;;  %v656_v7 = vld [vmem:[%s2310_s2 + $0x18] sm:$0xff]  ;;  %v1507_v9 = vld [vmem:[%s2311_s1 + $0x28] sm:$0xff] }
   0x4   :  { %497 = vmatpush.bf16.msra.mxu1 %v1693_v4  ;;  %1648 = vset.pattern.permute.xlu2 %v1650_v0  ;;  %v1717_v10 = vld [vmem:[%s2311_s1 + $0x68] sm:$0xff]  ;;  %v657_v11 = vld [vmem:[%s2310_s2 + $0x20] sm:$0xff]  ;;  %v660_v15 = vld [vmem:[%s2310_s2 + $0x38] sm:$0xff] }
   0x5   :  { %739 = vperm.xlu2 %1648, %v657_v11   ;;  %v1506_v12 = vld [vmem:[%s2311_s1 + $0x20] sm:$0xff]  ;;  %v658_v14 = vld [vmem:[%s2310_s2 + $0x28] sm:$0xff]  ;;  %v659_v16 = vld [vmem:[%s2310_s2 + $0x30] sm:$0xff] }
   0x6   :  { %v1729_v13 = vld [vmem:[%s2311_s1 + $0x60] sm:$0xff]  ;;  %v1505_v17 = vld [vmem:[%s2311_s1 + $0x18] sm:$0xff]  ;;  %v1504_v19 = vld [vmem:[%s2311_s1 + $0x10] sm:$0xff] }
   0x7   :  { %409 = vmatpush.bf16.msra.mxu0 %v1508_v5  ;;  %1622 = vmatpush.bf16.msra.mxu3 %v1508_v5  ;;  %v1747_v18 = vld [vmem:[%s2311_s1 + $0x58] sm:$0xff]  ;;  %v1756_v20 = vld [vmem:[%s2311_s1 + $0x50] sm:$0xff]  ;;  %v661_v21 = vld [vmem:[%s2310_s2 + $0x40] sm:$0xff] }
   0x8   :  { %498 = vmatpush.bf16.msra.mxu1 %v1702_v6  ;;  %v663_v22 = vld [vmem:[%s2310_s2 + $0x50] sm:$0xff]  ;;  %v662_v23 = vld [vmem:[%s2310_s2 + $0x48] sm:$0xff]  ;;  %v1502_v26 = vld [vmem:[%s2311_s1] sm:$0xff] }
   0x9   :  { %v1503_v24 = vld [vmem:[%s2311_s1 + $0x8] sm:$0xff]  ;;  %v1782_v27 = vld [vmem:[%s2311_s1 + $0x40] sm:$0xff]  ;;  %v664_v34 = vld [vmem:[%s2310_s2 + $0x58] sm:$0xff] }
   0xa   :  { %734 = vperm.xlu1 %1647, %v656_v7   ;;  %724 = vperm.xlu0 %1646, %v654_v8   ;;  %v1774_v25 = vld [vmem:[%s2311_s1 + $0x48] sm:$0xff]  ;;  %v1248_v28 = vld [vmem:[%s2312_s0] sm:$0xf]  ;;  %v1470_v32 = vld [vmem:[%s2312_s0 + $0x4] sm:$0xf] }
   0xb   :  { %410 = vmatpush.bf16.msra.mxu0 %v1507_v9  ;;  %1623 = vmatpush.bf16.msra.mxu3 %v1507_v9  ;;  %v1471_v29 = vld [vmem:[%s2312_s0 + $0x4] sm:$0xf0]  ;;  %v1344_v30 = vld [vmem:[%s2312_s0 + $0xc0] sm:$0xf]  ;;  %v1250_v33 = vld [vmem:[%s2312_s0 + $0x8] sm:$0xf0] }
   0xc   :  { %499 = vmatpush.bf16.msra.mxu1 %v1717_v10  ;;  %v1495_v31 = vld [vmem:[%s2312_s0 + $0xc4] sm:$0xf0]  ;;  %v665_v36 = vld [vmem:[%s2310_s2 + $0x60] sm:$0xff]  ;;  %v1249_v37 = vor.u32 %v1471_v29, %v1248_v28  ;;  %v1253_v39 = vor.u32 %v1470_v32, %v1250_v33  ;;  %v667_v40 = vld [vmem:[%s2310_s2 + $0x70] sm:$0xff] }
   0xd   :  { %744 = vperm.xlu2 %1648, %v658_v14   ;;  %v666_v35 = vld [vmem:[%s2310_s2 + $0x68] sm:$0xff]  ;;  %v1345_v38 = vor.u32 %v1495_v31, %v1344_v30  ;;  %v669_v41 = vld [vmem:[%s2310_s2 + $0x80] sm:$0xff]  ;;  %v668_v42 = vld [vmem:[%s2310_s2 + $0x78] sm:$0xff] }
   0xe   :  { %v1256_v43 = vld [vmem:[%s2312_s0 + $0x10] sm:$0xf]  ;;  %v1473_v44 = vld [vmem:[%s2312_s0 + $0x14] sm:$0xf0]  ;;  %v1472_v47 = vld [vmem:[%s2312_s0 + $0x14] sm:$0xf] }
   0xf   :  { %411 = vmatpush.bf16.msra.mxu0 %v1506_v12  ;;  %1624 = vmatpush.bf16.msra.mxu3 %v1506_v12  ;;  %v1352_v45 = vld [vmem:[%s2312_s0 + $0xd0] sm:$0xf]  ;;  %v1497_v46 = vld [vmem:[%s2312_s0 + $0xd4] sm:$0xf0]  ;;  %v1258_v48 = vld [vmem:[%s2312_s0 + $0x18] sm:$0xf0]  ;;  %v1257_v52 = vor.u32 %v1473_v44, %v1256_v43 }
  0x10   :  { %500 = vmatpush.bf16.msra.mxu1 %v1729_v13  ;;  %v670_v49 = vld [vmem:[%s2310_s2 + $0x88] sm:$0xff]  ;;  %v677_v51 = vld [vmem:[%s2310_s2 + $0xc0] sm:$0xff]  ;;  %v1353_v53 = vor.u32 %v1497_v46, %v1352_v45  ;;  %v1261_v54 = vor.u32 %v1472_v47, %v1258_v48  ;;  %v671_v55 = vld [vmem:[%s2310_s2 + $0x90] sm:$0xff] }
  0x11   :  { %v678_v50 = vld [vmem:[%s2310_s2 + $0xc8] sm:$0xff]  ;;  %v679_v56 = vld [vmem:[%s2310_s2 + $0xd0] sm:$0xff]  ;;  %v672_v57 = vld [vmem:[%s2310_s2 + $0x98] sm:$0xff] }
  0x12   :  { %754 = vperm.xlu1 %1647, %v660_v15   ;;  %749 = vperm.xlu0 %1646, %v659_v16   ;;  %v1264_v58 = vld [vmem:[%s2312_s0 + $0x20] sm:$0xf]  ;;  %v1475_v59 = vld [vmem:[%s2312_s0 + $0x24] sm:$0xf0]  ;;  %v1474_v62 = vld [vmem:[%s2312_s0 + $0x24] sm:$0xf] }
  0x13   :  { %412 = vmatpush.bf16.msra.mxu0 %v1505_v17  ;;  %1625 = vmatpush.bf16.msra.mxu3 %v1505_v17  ;;  %v1360_v60 = vld [vmem:[%s2312_s0 + $0xe0] sm:$0xf]  ;;  %v1499_v61 = vld [vmem:[%s2312_s0 + $0xe4] sm:$0xf0]  ;;  %v1266_v63 = vld [vmem:[%s2312_s0 + $0x28] sm:$0xf0]  ;;  %v1265_v3 = vor.u32 %v1475_v59, %v1264_v58 }
  0x14   :  { %501 = vmatpush.bf16.msra.mxu1 %v1747_v18  ;;  %v680_v0 = vld [vmem:[%s2310_s2 + $0xd8] sm:$0xff]  ;;  %v674_v1 = vld [vmem:[%s2310_s2 + $0xa8] sm:$0xff]  ;;  %v673_v2 = vld [vmem:[%s2310_s2 + $0xa0] sm:$0xff]  ;;  %v1269_v5 = vor.u32 %v1474_v62, %v1266_v63 }
  0x15   :  { %759 = vperm.xlu2 %1648, %v661_v21   ;;  %v675_v7 = vld [vmem:[%s2310_s2 + $0xb0] sm:$0xff]  ;;  %v682_v8 = vld [vmem:[%s2310_s2 + $0xe8] sm:$0xff]  ;;  %v1501_v12 = vld [vmem:[%s2312_s0 + $0xf4] sm:$0xf0] }
  0x16   :  { %v1272_v9 = vld [vmem:[%s2312_s0 + $0x30] sm:$0xf]  ;;  %v1274_v14 = vld [vmem:[%s2312_s0 + $0x38] sm:$0xf0]  ;;  %v1280_v21 = vld [vmem:[%s2312_s0 + $0x40] sm:$0xf] }
  0x17   :  { %413 = vmatpush.bf16.msra.mxu0 %v1504_v19  ;;  %1626 = vmatpush.bf16.msra.mxu3 %v1504_v19  ;;  %v1368_v11 = vld [vmem:[%s2312_s0 + $0xf0] sm:$0xf]  ;;  %v676_v15 = vld [vmem:[%s2310_s2 + $0xb8] sm:$0xff]  ;;  %v1496_v32 = vld [vmem:[%s2312_s0 + $0xd4] sm:$0xf] }
  0x18   :  { %502 = vmatpush.bf16.msra.mxu1 %v1756_v20  ;;  %v684_v16 = vld [vmem:[%s2310_s2 + $0xf8] sm:$0xff]  ;;  %v683_v17 = vld [vmem:[%s2310_s2 + $0xf0] sm:$0xff]  ;;  %v1369_v19 = vor.u32 %v1501_v12, %v1368_v11  ;;  %v1483_v43 = vld [vmem:[%s2312_s0 + $0x64] sm:$0xf0] }
  0x19   :  { %v1288_v30 = vld [vmem:[%s2312_s0 + $0x50] sm:$0xf]  ;;  %v1481_v31 = vld [vmem:[%s2312_s0 + $0x54] sm:$0xf0]  ;;  %v1354_v33 = vld [vmem:[%s2312_s0 + $0xd8] sm:$0xf0] }
  0x1a   :  { %769 = vperm.xlu1 %1647, %v663_v22   ;;  %764 = vperm.xlu0 %1646, %v662_v23   ;;  %v1479_v22 = vld [vmem:[%s2312_s0 + $0x44] sm:$0xf0]  ;;  %v1494_v23 = vld [vmem:[%s2312_s0 + $0xc4] sm:$0xf]  ;;  %v1362_v45 = vld [vmem:[%s2312_s0 + $0xe8] sm:$0xf0] }
  0x1b   :  { %414 = vmatpush.bf16.msra.mxu0 %v1503_v24  ;;  %1627 = vmatpush.bf16.msra.mxu3 %v1503_v24  ;;  %v1346_v24 = vld [vmem:[%s2312_s0 + $0xc8] sm:$0xf0]  ;;  %v1498_v44 = vld [vmem:[%s2312_s0 + $0xe4] sm:$0xf]  ;;  %v1370_v58 = vld [vmem:[%s2312_s0 + $0xf8] sm:$0xf0] }
  0x1c   :  { %503 = vmatpush.bf16.msra.mxu1 %v1774_v25  ;;  %v1349_v28 = vor.u32 %v1494_v23, %v1346_v24  ;;  %v1482_v46 = vld [vmem:[%s2312_s0 + $0x64] sm:$0xf]  ;;  %v1298_v47 = vld [vmem:[%s2312_s0 + $0x68] sm:$0xf0]  ;;  %v1484_v59 = vld [vmem:[%s2312_s0 + $0x74] sm:$0xf] }
  0x1d   :  { %774 = vperm.xlu2 %1648, %v664_v34   ;;  %v1480_v34 = vld [vmem:[%s2312_s0 + $0x54] sm:$0xf]  ;;  %v1518_v63 = vld [vmem:[%s2314_s4] sm:$0xff]  ;;  %v1322_v23 = vld [vmem:[%s2312_s0 + $0x98] sm:$0xf0] }
  0x1f   :  { %415 = vmatpush.bf16.msra.mxu0 %v1502_v26  ;;  %1628 = vmatpush.bf16.msra.mxu3 %v1502_v26  ;;  %v1282_v26 = vld [vmem:[%s2312_s0 + $0x48] sm:$0xf0] }
  0x20   :  { %504 = vmatpush.bf16.msra.mxu1 %v1782_v27 }
  0x22   :  { %784 = vperm.xlu1 %1647, %v666_v35   ;;  %779 = vperm.xlu0 %1646, %v665_v36   ;;  %v1290_v35 = vld [vmem:[%s2312_s0 + $0x58] sm:$0xf0]  ;;  %v1289_v36 = vor.u32 %v1481_v31, %v1288_v30 }
  0x23   :  { %1629 = vmatpush.bf16.msrb.mxu3 %v1693_v4  ;;  %416 = vmatmul.bf16.vlgmr.msra.gmra.mxu0 %v1249_v37  ;;  %v1361_v4 = vor.u32 %v1499_v61, %v1360_v60  ;;  %v1357_v37 = vor.u32 %v1496_v32, %v1354_v33  ;;  %v1306_v60 = vld [vmem:[%s2312_s0 + $0x78] sm:$0xf0] }
  0x24   :  { %476 = vmatmul.bf16.vlgmr.msra.gmra.mxu3 %v1345_v38  ;;  %505 = vmatmul.bf16.vlgmr.msra.gmra.mxu1 %v1253_v39  ;;  %v1293_v38 = vor.u32 %v1480_v34, %v1290_v35  ;;  %v1525_v39 = vld [vmem:[%s2314_s4 + $0x38] sm:$0xff] }
  0x25   :  { %789 = vperm.xlu2 %1648, %v667_v40   ;;  %1057 = vmatpush.bf16.msra.mxu2 %v1525_v39  ;;  %v1524_v40 = vld [vmem:[%s2314_s4 + $0x30] sm:$0xff] }
  0x27   :  { %1630 = vmatpush.bf16.msrb.mxu3 %v1702_v6  ;;  %v681_v6 = vld [vmem:[%s2310_s2 + $0xe0] sm:$0xff] }
  0x29   :  { %1058 = vmatpush.bf16.msra.mxu2 %v1524_v40 }
  0x2a   :  { %799 = vperm.xlu1 %1647, %v669_v41   ;;  %794 = vperm.xlu0 %1646, %v668_v42   ;;  %v1523_v41 = vld [vmem:[%s2314_s4 + $0x28] sm:$0xff]  ;;  %v1296_v42 = vld [vmem:[%s2312_s0 + $0x60] sm:$0xf] }
  0x2b   :  { %1631 = vmatpush.bf16.msrb.mxu3 %v1717_v10  ;;  %v1477_v10 = vld [vmem:[%s2312_s0 + $0x34] sm:$0xf0]  ;;  %v1297_v48 = vor.u32 %v1483_v43, %v1296_v42  ;;  %v1328_v43 = vld [vmem:[%s2312_s0 + $0xa0] sm:$0xf] }
  0x2d   :  { %804 = vperm.xlu2 %1648, %v670_v49   ;;  %1059 = vmatpush.bf16.msra.mxu2 %v1523_v41  ;;  %v1365_v49 = vor.u32 %v1498_v44, %v1362_v45  ;;  %v1491_v44 = vld [vmem:[%s2312_s0 + $0xa4] sm:$0xf0] }
  0x2f   :  { %1632 = vmatpush.bf16.msrb.mxu3 %v1729_v13  ;;  %v1476_v13 = vld [vmem:[%s2312_s0 + $0x34] sm:$0xf] }
  0x32   :  { %844 = vperm.xlu1 %1647, %v678_v50   ;;  %839 = vperm.xlu0 %1646, %v677_v51   ;;  %v1522_v50 = vld [vmem:[%s2314_s4 + $0x20] sm:$0xff]  ;;  %v1301_v51 = vor.u32 %v1482_v46, %v1298_v47  ;;  %v1330_v47 = vld [vmem:[%s2312_s0 + $0xa8] sm:$0xf0] }
  0x33   :  { %1633 = vmatpush.bf16.msrb.mxu3 %v1747_v18  ;;  %421 = vmatmul.bf16.gmra.mxu0 %v1257_v52  ;;  %v1273_v18 = vor.u32 %v1477_v10, %v1272_v9  ;;  %v1521_v52 = vld [vmem:[%s2314_s4 + $0x18] sm:$0xff]  ;;  %v1490_v46 = vld [vmem:[%s2312_s0 + $0xa4] sm:$0xf] }
  0x34   :  { %481 = vmatmul.bf16.gmra.mxu3 %v1353_v53  ;;  %510 = vmatmul.bf16.gmra.mxu1 %v1261_v54  ;;  %v1520_v53 = vld [vmem:[%s2314_s4 + $0x10] sm:$0xff] }
  0x35   :  { %809 = vperm.xlu2 %1648, %v671_v55   ;;  %1060 = vmatpush.bf16.msra.mxu2 %v1522_v50  ;;  %v1304_v54 = vld [vmem:[%s2312_s0 + $0x70] sm:$0xf]  ;;  %v1519_v55 = vld [vmem:[%s2314_s4 + $0x8] sm:$0xff] }
  0x37   :  { %1634 = vmatpush.bf16.msrb.mxu3 %v1756_v20  ;;  %v1277_v20 = vor.u32 %v1476_v13, %v1274_v14  ;;  %v2045_v14 = vld [vmem:[%s2313_s3] ss:$0 sm:$0xff] }
  0x39   :  { %1061 = vmatpush.bf16.msra.mxu2 %v1521_v52 }
  0x3a   :  { %849 = vperm.xlu1 %1647, %v679_v56   ;;  %814 = vperm.xlu0 %1646, %v672_v57   ;;  %v1485_v56 = vld [vmem:[%s2312_s0 + $0x74] sm:$0xf0]  ;;  %v1500_v57 = vld [vmem:[%s2312_s0 + $0xf4] sm:$0xf] }
  0x3b   :  { %1635 = vmatpush.bf16.msrb.mxu3 %v1774_v25  ;;  %v1478_v25 = vld [vmem:[%s2312_s0 + $0x44] sm:$0xf]  ;;  %v1305_v61 = vor.u32 %v1485_v56, %v1304_v54  ;;  %v1373_v62 = vor.u32 %v1500_v57, %v1370_v58 }
  0x3c   :  { %v1285_v29 = vor.u32 %v1478_v25, %v1282_v26 }
  0x3d   :  { %854 = vperm.xlu2 %1648, %v680_v0   ;;  %1062 = vmatpush.bf16.msra.mxu2 %v1520_v53  ;;  %v1309_v0 = vor.u32 %v1484_v59, %v1306_v60 }
  0x3f   :  { %1636 = vmatpush.bf16.msrb.mxu3 %v1782_v27  ;;  %v1281_v27 = vor.u32 %v1479_v22, %v1280_v21  ;;  %v1488_v22 = vld [vmem:[%s2312_s0 + $0x94] sm:$0xf] }
  0x41   :  { %1063 = vmatpush.bf16.msra.mxu2 %v1519_v55 }
  0x42   :  { %824 = vperm.xlu1 %1647, %v674_v1   ;;  %819 = vperm.xlu0 %1646, %v673_v2   ;;  %v1312_v1 = vld [vmem:[%s2312_s0 + $0x80] sm:$0xf]  ;;  %v1487_v2 = vld [vmem:[%s2312_s0 + $0x84] sm:$0xf0] }
  0x43   :  { %426 = vmatmul.bf16.gmra.mxu0 %v1265_v3  ;;  %1637 = vmatpush.bf16.msra.mxu3 %v1525_v39  ;;  %v1486_v3 = vld [vmem:[%s2312_s0 + $0x84] sm:$0xf] }
  0x44   :  { %486 = vmatmul.bf16.gmra.mxu3 %v1361_v4  ;;  %515 = vmatmul.bf16.gmra.mxu1 %v1269_v5  ;;  %v1314_v4 = vld [vmem:[%s2312_s0 + $0x88] sm:$0xf0]  ;;  %v1313_v5 = vor.u32 %v1487_v2, %v1312_v1 }
  0x45   :  { %859 = vperm.xlu2 %1648, %v681_v6   ;;  %1064 = vmatpush.bf16.msra.mxu2 %v1518_v63 }
  0x47   :  { %1638 = vmatpush.bf16.msra.mxu3 %v1524_v40 }
  0x4a   :  { %829 = vperm.xlu1 %1647, %v675_v7   ;;  %864 = vperm.xlu0 %1646, %v682_v8   ;;  %v1317_v7 = vor.u32 %v1486_v3, %v1314_v4  ;;  %v1336_v3 = vld [vmem:[%s2312_s0 + $0xb0] sm:$0xf]  ;;  %v1493_v4 = vld [vmem:[%s2312_s0 + $0xb4] sm:$0xf0] }
  0x4b   :  { %1639 = vmatpush.bf16.msra.mxu3 %v1523_v41 }
  0x4d   :  { %834 = vperm.xlu2 %1648, %v676_v15  }
  0x4f   :  { %1640 = vmatpush.bf16.msra.mxu3 %v1522_v50  ;;  %v1329_v50 = vor.u32 %v1491_v44, %v1328_v43 }
  0x52   :  { %874 = vperm.xlu1 %1647, %v684_v16   ;;  %869 = vperm.xlu0 %1646, %v683_v17  }
  0x53   :  { %431 = vmatmul.bf16.gmra.mxu0 %v1273_v18  ;;  %1641 = vmatpush.bf16.msra.mxu3 %v1521_v52  ;;  %v1333_v52 = vor.u32 %v1490_v46, %v1330_v47 }
  0x54   :  { %491 = vmatmul.bf16.gmra.mxu3 %v1369_v19  ;;  %520 = vmatmul.bf16.gmra.mxu1 %v1277_v20  ;;  %v1320_v19 = vld [vmem:[%s2312_s0 + $0x90] sm:$0xf]  ;;  %v1489_v20 = vld [vmem:[%s2312_s0 + $0x94] sm:$0xf0] }
  0x55   :  { %v1321_v26 = vor.u32 %v1489_v20, %v1320_v19 }
  0x57   :  { %1642 = vmatpush.bf16.msra.mxu3 %v1520_v53 }
  0x5b   :  { %1643 = vmatpush.bf16.msra.mxu3 %v1519_v55 }
  0x5f   :  { %1644 = vmatpush.bf16.msra.mxu3 %v1518_v63 }
  0x63   :  { %436 = vmatmul.bf16.gmra.mxu0 %v1281_v27 }
  0x64   :  { %565 = vmatmul.bf16.vlgmr.msrb.gmra.mxu3 %v1349_v28  ;;  %525 = vmatmul.bf16.gmra.mxu1 %v1285_v29  ;;  %v1325_v28 = vor.u32 %v1488_v22, %v1322_v23 }
  0x73   :  { %441 = vmatmul.bf16.gmra.mxu0 %v1289_v36 }
  0x74   :  { %570 = vmatmul.bf16.gmra.mxu3 %v1357_v37  ;;  %530 = vmatmul.bf16.gmra.mxu1 %v1293_v38  ;;  %v2037_v8 = vpop.permute.xlu0 %719  ;;  %v2066_v31 = vpop.permute.xlu1 %729 }
  0x75   :  { %v2071_v38 = vpop.permute.xlu2 %739 }
  0x7c   :  { %v2047_v17 = vpop.permute.xlu0 %724  ;;  %v2073_v41 = vpop.permute.xlu1 %734 }
  0x7d   :  { %v2092_v57 = vpop.permute.xlu2 %744 }
  0x83   :  { %446 = vmatmul.bf16.gmra.mxu0 %v1297_v48 }
  0x84   :  { %575 = vmatmul.bf16.gmra.mxu3 %v1365_v49  ;;  %535 = vmatmul.bf16.gmra.mxu1 %v1301_v51  ;;  %v2094_v58 = vpop.permute.xlu0 %749 }
  0x93   :  { %451 = vmatmul.bf16.gmra.mxu0 %v1305_v61  ;;  %v2098_v61 = vpop.permute.xlu1 %754 }
  0x94   :  { %580 = vmatmul.bf16.gmra.mxu3 %v1373_v62  ;;  %540 = vmatmul.bf16.gmra.mxu1 %v1309_v0 }
  0x9b   :  { %v2122_v22 = vpop.permute.xlu1 %769 }
  0xa0   :  { %v417_v6 = vpop.f32.mrf.mxu0 }
  0xa1   :  { %v506_v9 = vpop.f32.mrf.mxu1 }
  0xa2   :  { %v507_v10 = vadd.f32 %v506_v9, %v417_v6  ;;  %v2109_v6 = vpop.permute.xlu2 %759  ;;  %v1338_v9 = vld [vmem:[%s2312_s0 + $0xb8] sm:$0xf0] }
  0xa3   :  { %456 = vmatmul.bf16.gmra.mxu0 %v1313_v5 }
  0xa4   :  { %545 = vmatmul.bf16.gmra.mxu1 %v1317_v7  ;;  %v877_v12 = vmul.f32 %v2037_v8, %v507_v10  ;;  %v1492_v7 = vld [vmem:[%s2312_s0 + $0xb4] sm:$0xf]  ;;  %v2117_v10 = vpop.permute.xlu0 %764 }
  0xa6   :  { %v913_v21 = vadd.f32 %v2045_v14, %v877_v12 }
  0xa7   :  { %v2039_v11 = vpop.f32.mrf.mxu3 }
  0xa8   :  { %v419_v13 = vpop.f32.mrf.mxu0  ;;  %v945_v29 = vmax.f32 %v913_v21, 0.0 }
  0xa9   :  { %v508_v15 = vpop.f32.mrf.mxu1 }
  0xaa   :  { %v509_v16 = vadd.f32 %v508_v15, %v419_v13  ;;  %v1337_v15 = vor.u32 %v1493_v4, %v1336_v3 }
  0xac   :  { %v878_v18 = vmul.f32 %v2047_v17, %v509_v16 }
  0xae   :  { %v914_v25 = vadd.f32 %v2045_v14, %v878_v18  ;;  %v1341_v18 = vor.u32 %v1492_v7, %v1338_v9 }
  0xaf   :  { %v2063_v24 = vpop.f32.mrf.mxu3 }
  0xb0   :  { %v422_v27 = vpop.f32.mrf.mxu0  ;;  %v946_v30 = vmax.f32 %v914_v25, 0.0 }
  0xb1   :  { %v511_v32 = vpop.f32.mrf.mxu1 }
  0xb2   :  { %v977_v33 = vpack.c.bf16 %v946_v30, %v945_v29  ;;  %v512_v34 = vadd.f32 %v511_v32, %v422_v27  ;;  %v2126_v27 = vpop.permute.xlu2 %774 }
  0xb3   :  { %461 = vmatmul.bf16.gmra.mxu0 %v1321_v26 }
  0xb4   :  { %550 = vmatmul.bf16.gmra.mxu1 %v1325_v28  ;;  %1065 = vmatmul.bf16.vlgmr.msra.gmra.mxu2 %v977_v33  ;;  %v879_v36 = vmul.f32 %v2066_v31, %v512_v34  ;;  %v2128_v28 = vpop.permute.xlu0 %779  ;;  %v2131_v34 = vpop.permute.xlu1 %784 }
  0xb6   :  { %v915_v45 = vadd.f32 %v2045_v14, %v879_v36 }
  0xb7   :  { %v2068_v35 = vpop.f32.mrf.mxu3 }
  0xb8   :  { %v424_v37 = vpop.f32.mrf.mxu0  ;;  %v947_v53 = vmax.f32 %v915_v45, 0.0 }
  0xb9   :  { %v513_v39 = vpop.f32.mrf.mxu1 }
  0xba   :  { %v514_v40 = vadd.f32 %v513_v39, %v424_v37  ;;  %v2138_v46 = vpop.permute.xlu2 %789 }
  0xbc   :  { %v880_v42 = vmul.f32 %v2073_v41, %v514_v40  ;;  %v2140_v47 = vpop.permute.xlu0 %794 }
  0xbe   :  { %v916_v49 = vadd.f32 %v2045_v14, %v880_v42 }
  0xbf   :  { %v2089_v48 = vpop.f32.mrf.mxu3 }
  0xc0   :  { %v427_v51 = vpop.f32.mrf.mxu0  ;;  %v948_v54 = vmax.f32 %v916_v49, 0.0 }
  0xc1   :  { %v516_v55 = vpop.f32.mrf.mxu1 }
  0xc2   :  { %v978_v56 = vpack.c.bf16 %v948_v54, %v947_v53  ;;  %v517_v59 = vadd.f32 %v516_v55, %v427_v51  ;;  %v2142_v51 = vpop.permute.xlu1 %799 }
  0xc3   :  { %466 = vmatmul.bf16.gmra.mxu0 %v1329_v50 }
  0xc4   :  { %555 = vmatmul.bf16.gmra.mxu1 %v1333_v52  ;;  %1070 = vmatmul.bf16.gmra.mxu2 %v978_v56  ;;  %v881_v62 = vmul.f32 %v2071_v38, %v517_v59 }
  0xc6   :  { %v917_v5 = vadd.f32 %v2045_v14, %v881_v62  ;;  %v2146_v62 = vpop.permute.xlu2 %804 }
  0xc7   :  { %v2096_v60 = vpop.f32.mrf.mxu3 }
  0xc8   :  { %v429_v63 = vpop.f32.mrf.mxu0  ;;  %v949_v19 = vmax.f32 %v917_v5, 0.0 }
  0xc9   :  { %v518_v0 = vpop.f32.mrf.mxu1 }
  0xca   :  { %v519_v1 = vadd.f32 %v518_v0, %v429_v63  ;;  %v2148_v63 = vpop.permute.xlu0 %839  ;;  %v2155_v7 = vpop.permute.xlu1 %844 }
  0xcc   :  { %v882_v2 = vmul.f32 %v2092_v57, %v519_v1 }
  0xce   :  { %v918_v13 = vadd.f32 %v2045_v14, %v882_v2 }
  0xcf   :  { %v2119_v12 = vpop.f32.mrf.mxu3 }
  0xd0   :  { %v432_v16 = vpop.f32.mrf.mxu0  ;;  %v950_v20 = vmax.f32 %v918_v13, 0.0 }
  0xd1   :  { %v521_v21 = vpop.f32.mrf.mxu1 }
  0xd2   :  { %v979_v23 = vpack.c.bf16 %v950_v20, %v949_v19  ;;  %v522_v25 = vadd.f32 %v521_v21, %v432_v16 }
  0xd3   :  { %471 = vmatmul.bf16.gmra.mxu0 %v1337_v15 }
  0xd4   :  { %560 = vmatmul.bf16.gmra.mxu1 %v1341_v18  ;;  %1075 = vmatmul.bf16.gmra.mxu2 %v979_v23  ;;  %v883_v29 = vmul.f32 %v2094_v58, %v522_v25 }
  0xd6   :  { %v919_v37 = vadd.f32 %v2045_v14, %v883_v29  ;;  %v2160_v29 = vpop.permute.xlu2 %809 }
  0xd7   :  { %v2124_v26 = vpop.f32.mrf.mxu3 }
  0xd8   :  { %v434_v30 = vpop.f32.mrf.mxu0  ;;  %v951_v43 = vmax.f32 %v919_v37, 0.0 }
  0xd9   :  { %v523_v32 = vpop.f32.mrf.mxu1 }
  0xda   :  { %v524_v33 = vadd.f32 %v523_v32, %v434_v30 }
  0xdc   :  { %v884_v36 = vmul.f32 %v2098_v61, %v524_v33 }
  0xde   :  { %v920_v40 = vadd.f32 %v2045_v14, %v884_v36 }
  0xdf   :  { %v2135_v39 = vpop.f32.mrf.mxu3 }
  0xe0   :  { %v437_v42 = vpop.f32.mrf.mxu0  ;;  %v952_v44 = vmax.f32 %v920_v40, 0.0 }
  0xe1   :  { %v526_v45 = vpop.f32.mrf.mxu1 }
  0xe2   :  { %v980_v49 = vpack.c.bf16 %v952_v44, %v951_v43  ;;  %v527_v50 = vadd.f32 %v526_v45, %v437_v42  ;;  %v2164_v42 = vpop.permute.xlu1 %849  ;;  %v2166_v43 = vpop.permute.xlu0 %814 }
  0xe4   :  { %1080 = vmatmul.bf16.gmra.mxu2 %v980_v49  ;;  %v885_v53 = vmul.f32 %v2109_v6, %v527_v50 }
  0xe6   :  { %v921_v1 = vadd.f32 %v2045_v14, %v885_v53 }
  0xe7   :  { %v566_v52 = vpop.f32.mrf.mxu3 }
  0xe8   :  { %v439_v54 = vpop.f32.mrf.mxu0  ;;  %v567_v55 = vadd.f32 %v566_v52, %v2039_v11  ;;  %v953_v9 = vmax.f32 %v921_v1, 0.0 }
  0xe9   :  { %v528_v56 = vpop.f32.mrf.mxu1 }
  0xea   :  { %v529_v59 = vadd.f32 %v528_v56, %v439_v54  ;;  %v901_v2 = vmul.f32 %v2148_v63, %v567_v55  ;;  %v2173_v54 = vpop.permute.xlu2 %854 }
  0xec   :  { %v886_v0 = vmul.f32 %v2117_v10, %v529_v59  ;;  %v937_v15 = vadd.f32 %v2045_v14, %v901_v2 }
  0xee   :  { %v922_v4 = vadd.f32 %v2045_v14, %v886_v0  ;;  %v969_v23 = vmax.f32 %v937_v15, 0.0 }
  0xef   :  { %v568_v3 = vpop.f32.mrf.mxu3 }
  0xf0   :  { %v569_v5 = vadd.f32 %v568_v3, %v2063_v24  ;;  %v442_v11 = vpop.f32.mrf.mxu0  ;;  %v954_v13 = vmax.f32 %v922_v4, 0.0 }
  0xf1   :  { %v531_v18 = vpop.f32.mrf.mxu1 }
  0xf2   :  { %v902_v16 = vmul.f32 %v2155_v7, %v569_v5  ;;  %v981_v19 = vpack.c.bf16 %v954_v13, %v953_v9  ;;  %v532_v21 = vadd.f32 %v531_v18, %v442_v11  ;;  %v2178_v9 = vpop.permute.xlu0 %819 }
  0xf4   :  { %v938_v20 = vadd.f32 %v2045_v14, %v902_v16  ;;  %1085 = vmatmul.bf16.gmra.mxu2 %v981_v19  ;;  %v887_v32 = vmul.f32 %v2122_v22, %v532_v21  ;;  %v2182_v21 = vpop.permute.xlu1 %824 }
  0xf6   :  { %v970_v25 = vmax.f32 %v938_v20, 0.0  ;;  %v923_v45 = vadd.f32 %v2045_v14, %v887_v32 }
  0xf7   :  { %v571_v24 = vpop.f32.mrf.mxu3 }
  0xf8   :  { %v989_v30 = vpack.c.bf16 %v970_v25, %v969_v23  ;;  %v444_v33 = vpop.f32.mrf.mxu0  ;;  %v572_v36 = vadd.f32 %v571_v24, %v2068_v35  ;;  %v955_v55 = vmax.f32 %v923_v45, 0.0  ;;  %v2184_v23 = vpop.permute.xlu2 %859 }
  0xf9   :  { %v533_v37 = vpop.f32.mrf.mxu1 }
  0xfa   :  { %1125 = vmatmul.bf16.vlgmr.msra.gmra.mxu3 %v989_v30  ;;  %v534_v40 = vadd.f32 %v533_v37, %v444_v33  ;;  %v903_v49 = vmul.f32 %v2164_v42, %v572_v36  ;;  %v2191_v37 = vpop.permute.xlu0 %864 }
  0xfc   :  { %v888_v44 = vmul.f32 %v2126_v27, %v534_v40  ;;  %v939_v1 = vadd.f32 %v2045_v14, %v903_v49 }
  0xfe   :  { %v924_v52 = vadd.f32 %v2045_v14, %v888_v44  ;;  %v971_v5 = vmax.f32 %v939_v1, 0.0 }
  0xff   :  { %v573_v50 = vpop.f32.mrf.mxu3 }
 0x100   :  { %v574_v53 = vadd.f32 %v573_v50, %v2089_v48  ;;  %v447_v35 = vpop.f32.mrf.mxu0  ;;  %v956_v56 = vmax.f32 %v924_v52, 0.0 }
 0x101   :  { %v536_v0 = vpop.f32.mrf.mxu1 }
 0x102   :  { %v904_v59 = vmul.f32 %v2173_v54, %v574_v53  ;;  %v982_v2 = vpack.c.bf16 %v956_v56, %v955_v55  ;;  %v537_v4 = vadd.f32 %v536_v0, %v447_v35 }
 0x104   :  { %v940_v3 = vadd.f32 %v2045_v14, %v904_v59  ;;  %1090 = vmatmul.bf16.gmra.mxu2 %v982_v2  ;;  %v889_v15 = vmul.f32 %v2128_v28, %v537_v4  ;;  %v2196_v59 = vpop.permute.xlu1 %829 }
 0x106   :  { %v972_v11 = vmax.f32 %v940_v3, 0.0  ;;  %v925_v24 = vadd.f32 %v2045_v14, %v889_v15 }
 0x107   :  { %v576_v48 = vpop.f32.mrf.mxu3 }
 0x108   :  { %v990_v13 = vpack.c.bf16 %v972_v11, %v971_v5  ;;  %v449_v16 = vpop.f32.mrf.mxu0  ;;  %v577_v18 = vadd.f32 %v576_v48, %v2096_v60  ;;  %v957_v40 = vmax.f32 %v925_v24, 0.0  ;;  %v2200_v11 = vpop.permute.xlu0 %869 }
 0x109   :  { %v538_v19 = vpop.f32.mrf.mxu1 }
 0x10a   :  { %1130 = vmatmul.bf16.gmra.mxu3 %v990_v13  ;;  %v539_v20 = vadd.f32 %v538_v19, %v449_v16  ;;  %v905_v30 = vmul.f32 %v2184_v23, %v577_v18 }
 0x10c   :  { %v890_v25 = vmul.f32 %v2131_v34, %v539_v20  ;;  %v941_v50 = vadd.f32 %v2045_v14, %v905_v30  ;;  %v2207_v20 = vpop.permute.xlu1 %874 }
 0x10e   :  { %v926_v33 = vadd.f32 %v2045_v14, %v890_v25  ;;  %v973_v55 = vmax.f32 %v941_v50, 0.0 }
 0x10f   :  { %v578_v32 = vpop.f32.mrf.mxu3 }
 0x110   :  { %v579_v36 = vadd.f32 %v578_v32, %v2119_v12  ;;  %v452_v60 = vpop.f32.mrf.mxu0  ;;  %v958_v44 = vmax.f32 %v926_v33, 0.0 }
 0x111   :  { %v541_v49 = vpop.f32.mrf.mxu1 }
 0x112   :  { %v906_v45 = vmul.f32 %v2191_v37, %v579_v36  ;;  %v983_v52 = vpack.c.bf16 %v958_v44, %v957_v40  ;;  %v542_v35 = vadd.f32 %v541_v49, %v452_v60 }
 0x114   :  { %v942_v53 = vadd.f32 %v2045_v14, %v906_v45  ;;  %1095 = vmatmul.bf16.gmra.mxu2 %v983_v52  ;;  %v891_v1 = vmul.f32 %v2138_v46, %v542_v35 }
 0x116   :  { %v974_v56 = vmax.f32 %v942_v53, 0.0  ;;  %v927_v13 = vadd.f32 %v2045_v14, %v891_v1 }
 0x117   :  { %v581_v12 = vpop.f32.mrf.mxu3 }
 0x118   :  { %v991_v0 = vpack.c.bf16 %v974_v56, %v973_v55  ;;  %v454_v2 = vpop.f32.mrf.mxu0  ;;  %v582_v3 = vadd.f32 %v581_v12, %v2124_v26  ;;  %v959_v26 = vmax.f32 %v927_v13, 0.0 }
 0x119   :  { %v543_v4 = vpop.f32.mrf.mxu1 }
 0x11a   :  { %1135 = vmatmul.bf16.gmra.mxu3 %v991_v0  ;;  %v544_v5 = vadd.f32 %v543_v4, %v454_v2  ;;  %v907_v15 = vmul.f32 %v2200_v11, %v582_v3 }
 0x11c   :  { %v892_v48 = vmul.f32 %v2140_v47, %v544_v5  ;;  %v943_v33 = vadd.f32 %v2045_v14, %v907_v15 }
 0x11e   :  { %v928_v18 = vadd.f32 %v2045_v14, %v892_v48  ;;  %v975_v44 = vmax.f32 %v943_v33, 0.0 }
 0x11f   :  { %v583_v16 = vpop.f32.mrf.mxu3 }
 0x120   :  { %v584_v19 = vadd.f32 %v583_v16, %v2135_v39  ;;  %v457_v25 = vpop.f32.mrf.mxu0  ;;  %v960_v24 = vmax.f32 %v928_v18, 0.0 }
 0x121   :  { %v546_v32 = vpop.f32.mrf.mxu1 }
 0x122   :  { %v908_v30 = vmul.f32 %v2207_v20, %v584_v19  ;;  %v984_v36 = vpack.c.bf16 %v960_v24, %v959_v26  ;;  %v547_v40 = vadd.f32 %v546_v32, %v457_v25 }
 0x124   :  { %v944_v60 = vadd.f32 %v2045_v14, %v908_v30  ;;  %1100 = vmatmul.bf16.gmra.mxu2 %v984_v36  ;;  %v893_v39 = vmul.f32 %v2142_v51, %v547_v40 }
 0x126   :  { %v976_v45 = vmax.f32 %v944_v60, 0.0  ;;  %v929_v55 = vadd.f32 %v2045_v14, %v893_v39 }
 0x128   :  { %v992_v49 = vpack.c.bf16 %v976_v45, %v975_v44  ;;  %v459_v50 = vpop.f32.mrf.mxu0  ;;  %v961_v0 = vmax.f32 %v929_v55, 0.0 }
 0x129   :  { %v548_v52 = vpop.f32.mrf.mxu1 }
 0x12a   :  { %1140 = vmatmul.bf16.gmra.mxu3 %v992_v49  ;;  %v549_v53 = vadd.f32 %v548_v52, %v459_v50 }
 0x12c   :  { %v894_v35 = vmul.f32 %v2146_v62, %v549_v53 }
 0x12e   :  { %v930_v56 = vadd.f32 %v2045_v14, %v894_v35 }
 0x130   :  { %v462_v12 = vpop.f32.mrf.mxu0  ;;  %v962_v1 = vmax.f32 %v930_v56, 0.0 }
 0x131   :  { %v551_v2 = vpop.f32.mrf.mxu1 }
 0x132   :  { %v985_v3 = vpack.c.bf16 %v962_v1, %v961_v0  ;;  %v552_v4 = vadd.f32 %v551_v2, %v462_v12 }
 0x134   :  { %1105 = vmatmul.bf16.gmra.mxu2 %v985_v3  ;;  %v895_v48 = vmul.f32 %v2160_v29, %v552_v4 }
 0x136   :  { %v931_v19 = vadd.f32 %v2045_v14, %v895_v48 }
 0x137   :  { %v1066_v5 = vpop.f32.mrf.mxu2 }
 0x138   :  { %v464_v13 = vpop.f32.mrf.mxu0  ;;  %v1146_v24 = vmul.f32 %v1066_v5, %v2037_v8  ;;  %v963_v33 = vmax.f32 %v931_v19, 0.0  ;;  %v2235_v19 = vpop.permute.xlu2 %834 }
 0x139   :  { %v553_v15 = vpop.f32.mrf.mxu1 }
 0x13a   :  { %v554_v16 = vadd.f32 %v553_v15, %v464_v13 }
 0x13c   :  { %v896_v18 = vmul.f32 %v2166_v43, %v554_v16 }
 0x13e   :  { %v932_v25 = vadd.f32 %v2045_v14, %v896_v18 }
 0x13f   :  { %v1068_v26 = vpop.f32.mrf.mxu2 }
 0x140   :  { %v1147_v30 = vmul.f32 %v1068_v26, %v2047_v17  ;;  %v467_v32 = vpop.f32.mrf.mxu0  ;;  %v964_v36 = vmax.f32 %v932_v25, 0.0 }
 0x141   :  { %v556_v60 = vpop.f32.mrf.mxu1 }
 0x142   :  { %v1529_v40 = vpack.c.bf16 %v1147_v30, %v1146_v24  ;;  %v986_v44 = vpack.c.bf16 %v964_v36, %v963_v33  ;;  %v557_v45 = vadd.f32 %v556_v60, %v467_v32 }
 0x144   :  { %1530 = vst [vmem:[%s2315_s5] sm:$0xff] %v1529_v40   ;;  %1110 = vmatmul.bf16.gmra.mxu2 %v986_v44  ;;  %v897_v39 = vmul.f32 %v2178_v9, %v557_v45 }
 0x146   :  { %v933_v53 = vadd.f32 %v2045_v14, %v897_v39 }
 0x147   :  { %v1071_v49 = vpop.f32.mrf.mxu2 }
 0x148   :  { %v469_v50 = vpop.f32.mrf.mxu0  ;;  %v1148_v56 = vmul.f32 %v1071_v49, %v2066_v31  ;;  %v965_v1 = vmax.f32 %v933_v53, 0.0 }
 0x149   :  { %v558_v52 = vpop.f32.mrf.mxu1 }
 0x14a   :  { %v559_v8 = vadd.f32 %v558_v52, %v469_v50 }
 0x14c   :  { %v898_v17 = vmul.f32 %v2182_v21, %v559_v8 }
 0x14e   :  { %v934_v35 = vadd.f32 %v2045_v14, %v898_v17 }
 0x14f   :  { %v1073_v55 = vpop.f32.mrf.mxu2 }
 0x150   :  { %v1149_v12 = vmul.f32 %v1073_v55, %v2073_v41  ;;  %v472_v0 = vpop.f32.mrf.mxu0  ;;  %v966_v2 = vmax.f32 %v934_v35, 0.0 }
 0x151   :  { %v561_v3 = vpop.f32.mrf.mxu1 }
 0x152   :  { %v1534_v4 = vpack.c.bf16 %v1149_v12, %v1148_v56  ;;  %v987_v5 = vpack.c.bf16 %v966_v2, %v965_v1  ;;  %v562_v48 = vadd.f32 %v561_v3, %v472_v0 }
 0x154   :  { %1606 = vst [vmem:[%s2315_s5 + $0x8] sm:$0xff] %v1534_v4   ;;  %1115 = vmatmul.bf16.gmra.mxu2 %v987_v5  ;;  %v899_v15 = vmul.f32 %v2196_v59, %v562_v48 }
 0x156   :  { %v935_v25 = vadd.f32 %v2045_v14, %v899_v15 }
 0x157   :  { %v1076_v13 = vpop.f32.mrf.mxu2 }
 0x158   :  { %v474_v16 = vpop.f32.mrf.mxu0  ;;  %v1150_v30 = vmul.f32 %v1076_v13, %v2071_v38  ;;  %v967_v33 = vmax.f32 %v935_v25, 0.0 }
 0x159   :  { %v563_v18 = vpop.f32.mrf.mxu1 }
 0x15a   :  { %v564_v31 = vadd.f32 %v563_v18, %v474_v16 }
 0x15c   :  { %v900_v41 = vmul.f32 %v2235_v19, %v564_v31 }
 0x15e   :  { %v936_v26 = vadd.f32 %v2045_v14, %v900_v41 }
 0x15f   :  { %v1078_v24 = vpop.f32.mrf.mxu2 }
 0x160   :  { %v1151_v32 = vmul.f32 %v1078_v24, %v2092_v57  ;;  %v968_v36 = vmax.f32 %v936_v26, 0.0 }
 0x162   :  { %v1539_v60 = vpack.c.bf16 %v1151_v32, %v1150_v30  ;;  %v988_v40 = vpack.c.bf16 %v968_v36, %v967_v33 }
 0x164   :  { %1607 = vst [vmem:[%s2315_s5 + $0x10] sm:$0xff] %v1539_v60   ;;  %1120 = vmatmul.bf16.gmra.mxu2 %v988_v40 }
 0x167   :  { %v1081_v44 = vpop.f32.mrf.mxu2 }
 0x168   :  { %v1152_v49 = vmul.f32 %v1081_v44, %v2094_v58 }
 0x16f   :  { %v1083_v45 = vpop.f32.mrf.mxu2 }
 0x170   :  { %v1153_v14 = vmul.f32 %v1083_v45, %v2098_v61 }
 0x172   :  { %v1544_v39 = vpack.c.bf16 %v1153_v14, %v1152_v49 }
 0x174   :  { %1608 = vst [vmem:[%s2315_s5 + $0x18] sm:$0xff] %v1544_v39  }
 0x177   :  { %v1086_v38 = vpop.f32.mrf.mxu2 }
 0x178   :  { %v1154_v52 = vmul.f32 %v1086_v38, %v2109_v6 }
 0x17d   :  { %v1126_v57 = vpop.f32.mrf.mxu3 }
 0x17e   :  { %v1170_v61 = vmul.f32 %v1126_v57, %v2148_v63 }
 0x17f   :  { %v1088_v50 = vpop.f32.mrf.mxu2 }
 0x180   :  { %v1155_v8 = vmul.f32 %v1088_v50, %v2117_v10 }
 0x182   :  { %v1549_v17 = vpack.c.bf16 %v1155_v8, %v1154_v52 }
 0x184   :  { %1609 = vst [vmem:[%s2315_s5 + $0x20] sm:$0xff] %v1549_v17  }
 0x185   :  { %v1128_v58 = vpop.f32.mrf.mxu3 }
 0x186   :  { %v1171_v53 = vmul.f32 %v1128_v58, %v2155_v7 }
 0x187   :  { %v1091_v55 = vpop.f32.mrf.mxu2 }
 0x188   :  { %v1589_v35 = vpack.c.bf16 %v1171_v53, %v1170_v61  ;;  %v1156_v10 = vmul.f32 %v1091_v55, %v2122_v22 }
 0x18a   :  { %1617 = vst [vmem:[%s2315_s5 + $0x60] sm:$0xff] %v1589_v35  }
 0x18d   :  { %v1131_v56 = vpop.f32.mrf.mxu3 }
 0x18e   :  { %v1172_v7 = vmul.f32 %v1131_v56, %v2164_v42 }
 0x18f   :  { %v1093_v6 = vpop.f32.mrf.mxu2 }
 0x190   :  { %v1157_v12 = vmul.f32 %v1093_v6, %v2126_v27 }
 0x192   :  { %v1554_v0 = vpack.c.bf16 %v1157_v12, %v1156_v10 }
 0x194   :  { %1610 = vst [vmem:[%s2315_s5 + $0x28] sm:$0xff] %v1554_v0  }
 0x195   :  { %v1133_v63 = vpop.f32.mrf.mxu3 }
 0x196   :  { %v1173_v1 = vmul.f32 %v1133_v63, %v2173_v54 }
 0x197   :  { %v1096_v3 = vpop.f32.mrf.mxu2 }
 0x198   :  { %v1594_v2 = vpack.c.bf16 %v1173_v1, %v1172_v7  ;;  %v1158_v27 = vmul.f32 %v1096_v3, %v2128_v28 }
 0x19a   :  { %1618 = vst [vmem:[%s2315_s5 + $0x68] sm:$0xff] %v1594_v2  }
 0x19d   :  { %v1136_v4 = vpop.f32.mrf.mxu3 }
 0x19e   :  { %v1174_v54 = vmul.f32 %v1136_v4, %v2184_v23 }
 0x19f   :  { %v1098_v22 = vpop.f32.mrf.mxu2 }
 0x1a0   :  { %v1159_v5 = vmul.f32 %v1098_v22, %v2131_v34 }
 0x1a2   :  { %v1559_v48 = vpack.c.bf16 %v1159_v5, %v1158_v27 }
 0x1a4   :  { %1611 = vst [vmem:[%s2315_s5 + $0x30] sm:$0xff] %v1559_v48  }
 0x1a5   :  { %v1138_v42 = vpop.f32.mrf.mxu3 }
 0x1a6   :  { %v1175_v13 = vmul.f32 %v1138_v42, %v2191_v37 }
 0x1a7   :  { %v1101_v16 = vpop.f32.mrf.mxu2 }
 0x1a8   :  { %v1599_v15 = vpack.c.bf16 %v1175_v13, %v1174_v54  ;;  %v1160_v34 = vmul.f32 %v1101_v16, %v2138_v46 }
 0x1aa   :  { %1619 = vst [vmem:[%s2315_s5 + $0x70] sm:$0xff] %v1599_v15  }
 0x1ad   :  { %v1141_v18 = vpop.f32.mrf.mxu3 }
 0x1ae   :  { %v1176_v37 = vmul.f32 %v1141_v18, %v2200_v11 }
 0x1af   :  { %v1103_v28 = vpop.f32.mrf.mxu2 }
 0x1b0   :  { %v1161_v31 = vmul.f32 %v1103_v28, %v2140_v47 }
 0x1b2   :  { %v1564_v41 = vpack.c.bf16 %v1161_v31, %v1160_v34 }
 0x1b4   :  { %1612 = vst [vmem:[%s2315_s5 + $0x38] sm:$0xff] %v1564_v41  }
 0x1b5   :  { %v1143_v23 = vpop.f32.mrf.mxu3 }
 0x1b6   :  { %v1177_v25 = vmul.f32 %v1143_v23, %v2207_v20 }
 0x1b7   :  { %v1106_v24 = vpop.f32.mrf.mxu2 }
 0x1b8   :  { %v1604_v26 = vpack.c.bf16 %v1177_v25, %v1176_v37  ;;  %v1162_v46 = vmul.f32 %v1106_v24, %v2142_v51 }
 0x1ba   :  { %1620 = vst [vmem:[%s2315_s5 + $0x78] sm:$0xff] %v1604_v26  }
 0x1bf   :  { %v1108_v30 = vpop.f32.mrf.mxu2 }
 0x1c0   :  { %v1163_v47 = vmul.f32 %v1108_v30, %v2146_v62 }
 0x1c2   :  { %v1569_v32 = vpack.c.bf16 %v1163_v47, %v1162_v46 }
 0x1c4   :  { %1613 = vst [vmem:[%s2315_s5 + $0x40] sm:$0xff] %v1569_v32  }
 0x1c7   :  { %v1111_v33 = vpop.f32.mrf.mxu2 }
 0x1c8   :  { %v1164_v20 = vmul.f32 %v1111_v33, %v2160_v29 }
 0x1cf   :  { %v1113_v11 = vpop.f32.mrf.mxu2 }
 0x1d0   :  { %v1165_v36 = vmul.f32 %v1113_v11, %v2166_v43 }
 0x1d2   :  { %v1574_v60 = vpack.c.bf16 %v1165_v36, %v1164_v20 }
 0x1d4   :  { %1614 = vst [vmem:[%s2315_s5 + $0x48] sm:$0xff] %v1574_v60  }
 0x1d7   :  { %v1116_v40 = vpop.f32.mrf.mxu2 }
 0x1d8   :  { %v1166_v62 = vmul.f32 %v1116_v40, %v2178_v9 }
 0x1df   :  { %v1118_v51 = vpop.f32.mrf.mxu2 }
 0x1e0   :  { %v1167_v44 = vmul.f32 %v1118_v51, %v2182_v21 }
 0x1e2   :  { %v1579_v45 = vpack.c.bf16 %v1167_v44, %v1166_v62 }
 0x1e4   :  { %1615 = vst [vmem:[%s2315_s5 + $0x50] sm:$0xff] %v1579_v45  }
 0x1e7   :  { %v1121_v49 = vpop.f32.mrf.mxu2 }
 0x1e8   :  { %v1168_v43 = vmul.f32 %v1121_v49, %v2196_v59 }
 0x1ef   :  { %v1123_v29 = vpop.f32.mrf.mxu2 }
 0x1f0   :  { %v1169_v14 = vmul.f32 %v1123_v29, %v2235_v19 }
 0x1f2   :  { %v1584_v39 = vpack.c.bf16 %v1169_v14, %v1168_v43 }
 0x1f4   :  { %1616 = vst [vmem:[%s2315_s5 + $0x58] sm:$0xff] %v1584_v39  }

</bundles_post_ra>
